<compile_context>
chip_gen: v6e
topology: v6e:2x2x1
jax: 0.10.0
libtpu: 0.0.40
codegen_flags: <defaults>
</compile_context>

<pallas_src>
import functools
from math import sqrt

import jax
import jax.numpy as jnp
from jax import lax
from jax.experimental import pallas as pl
from jax.experimental.pallas import tpu as pltpu


def _cross_attn_kernel(q1_ref, k1_ref, q2_ref, k2_ref, v1_ref, out_ref,
                       acc_ref, q1s_ref, q2s_ref, *, scale, gate_dtype):
    # Kernel-visible tiles (batch dim squeezed, G = heads per block):
    #   q1_ref, q2_ref : (bl, G, E)      k1_ref, k2_ref : (bs, G, E)
    #   v1_ref         : (bs, G, D)      out_ref        : (bl, G, D)
    #   acc_ref        : (G, bl, D) f32 accumulator over the S grid axis
    #   q1s_ref/q2s_ref: (G, bl, E) scaled, head-major q stash
    s_idx = pl.program_id(3)

    @pl.when(s_idx == 0)
    def _init():
        acc_ref[...] = jnp.zeros_like(acc_ref)
        # The q block only changes when (b, h, l) change, i.e. exactly when
        # s_idx == 0: hoist the scale and the head-major relayout out of the S
        # loop.  The 0.5 of sigmoid(x) = 0.5*tanh(x/2) + 0.5 is folded into the
        # q2 scale.
        q1s_ref[...] = jnp.swapaxes(q1_ref[...], 0, 1) * scale
        q2s_ref[...] = jnp.swapaxes(q2_ref[...], 0, 1) * (0.5 * scale)

    k1 = k1_ref[...]                        # (bs, G, E), native dtype
    k2 = k2_ref[...]
    v1 = v1_ref[...]                        # (bs, G, D)

    # Head-batched NT matmuls on the MXU, f32 accumulation, operands native dtype.
    s1 = jnp.einsum('gle,sge->gls', q1s_ref[...], k1,
                    preferred_element_type=jnp.float32)      # (G, bl, bs)
    s2 = jnp.einsum('gle,sge->gls', q2s_ref[...], k2,
                    preferred_element_type=jnp.float32)

    # Gate: tanh(s1*scale) * sigmoid(s2*scale) with sigmoid expressed through
    # tanh -> 2 EUP transcendentals per element instead of 3+ (EUP is the binding
    # unit on v6e/v7x); the mul/add are free VPU slots under that bottleneck.
    # TODO(synk): nn.Dropout(0.1) is identity in eval mode; training-mode dropout
    # would need pltpu.prng_seed + pltpu.stateful_bernoulli on each gate factor.
    s1 = s1.astype(gate_dtype)
    s2 = s2.astype(gate_dtype)
    a = jnp.tanh(s1) * (jnp.tanh(s2) * 0.5 + 0.5)            # (G, bl, bs), in [-1, 1]

    # (G, bl, bs) x (bs, G, D) -> (G, bl, D), accumulated in f32 over S tiles.
    acc_ref[...] += jnp.einsum('gls,sgd->gld', a.astype(v1.dtype), v1,
                               preferred_element_type=jnp.float32)

    @pl.when(s_idx == pl.num_programs(3) - 1)
    def _finalize():
        # Single relayout per output tile back to the (bl, G, D) block of the
        # original (B, L, H, D) layout — no wrapper-side transposes.
        out_ref[...] = jnp.swapaxes(acc_ref[...], 0, 1).astype(out_ref.dtype)


def _pick_block(dim, target):
    """Largest block <= target that evenly divides dim.

    Never silently falls back to the full dimension (the old behaviour could
    blow v7x's 64 MiB VMEM via the f32 score intermediates).
    # TODO(synk): pad/mask the ragged tail instead of shrinking for awkward
    # (e.g. prime) sequence lengths.
    """
    target = max(1, min(dim, target))
    for b in range(target, 0, -1):
        if dim % b == 0:
            return b
    return 1


def _pick_head_group(num_heads, target):
    """Heads per block: each strided DMA row becomes G*E (G*D) contiguous.

    Mosaic's (8, 128) block rule needs the second-to-last block dim to be a
    multiple of 8 or the full dimension, so G is either H itself or an
    8-aligned divisor of H.
    """
    if num_heads <= target:
        return num_heads
    start = min(num_heads, target)
    start -= start % 8
    for g in range(start, 0, -8):
        if num_heads % g == 0:
            return g
    return num_heads


def cross_attention(q1, k1, v1, q2, k2, v2, attn_mask=None, scale=None,
                    block_l=512, block_s=1024, head_group=8):
    """Pallas implementation of Cross_Attention.forward (eval mode).

    q1, q2 : (B, L, H, E)    k1, k2 : (B, S, H, E)    v1, v2 : (B, S, H, D)
    Returns (out, None) with out : (B, L, H, D).  v2 and attn_mask are unused,
    matching the reference forward.
    """
    del v2, attn_mask  # unused in the reference forward
    B, L, H, E = q1.shape
    _, S, _, D = v1.shape
    scale = scale if scale is not None else 1.0 / sqrt(E)

    G = _pick_head_group(H, head_group)
    bl = _pick_block(L, block_l)

    # v7x megacore: make sure there are >= 2 parallel grid steps so both
    # TensorCores get work (no-op on single-core v5e/v6e).
    if B * (H // G) * (L // bl) < 2 and bl > 8:
        bl = _pick_block(L, max(8, bl // 2))

    # The f32 (G, bl, bs) score/gate intermediates dominate the transient VMEM
    # footprint: keep 3 * G * bl * bs * 4 B under ~24 MiB so tiles + accumulator
    # + Mosaic scratch stay well inside v7x's 64 MiB VMEM (v5e/v6e: 128 MiB).
    score_budget = 24 * 1024 * 1024
    bs_cap = max(128, score_budget // (3 * 4 * G * bl))
    bs = _pick_block(S, min(block_s, bs_cap))

    # bf16 gate only when the inputs are bf16 (2x EUP rate on v6e/v7x); f32
    # inputs keep an f32 gate (also the right choice for v5e, no bf16 VPU/EUP).
    gate_dtype = jnp.bfloat16 if q1.dtype == jnp.bfloat16 else jnp.float32

    # Explicit VMEM budget: double-buffered tiles + scratch + score transients
    # + headroom for Mosaic internals; never pinned to the full physical VMEM.
    qk_sz = jnp.dtype(q1.dtype).itemsize
    v_sz = jnp.dtype(v1.dtype).itemsize
    tiles = 2 * (2 * bl * G * E * qk_sz + 2 * bs * G * E * qk_sz + bs * G * D * v_sz)
    tiles += 2 * bl * G * D * qk_sz                        # output (double-buffered)
    scratch = G * bl * D * 4 + 2 * G * bl * E * qk_sz      # accumulator + scaled q
    scores = 3 * G * bl * bs * 4                           # s1, s2, gate (f32 bound)
    vmem_bytes = int(min(max(tiles + scratch + scores + (8 << 20), 32 << 20), 64 << 20))

    # Tile the original (B, *, H, *) layouts directly; the head group G keeps
    # each strided DMA row G*E (G*D) contiguous instead of a single head's E.
    # (If a trace still shows the strided K/V loads exposed, their specs can take
    #  pipeline_mode=pl.Buffered(3) — cheap given the small K/V tiles.)
    q_spec = pl.BlockSpec((None, bl, G, E), lambda b, h, l, s: (b, l, h, 0))
    k_spec = pl.BlockSpec((None, bs, G, E), lambda b, h, l, s: (b, s, h, 0))
    v_spec = pl.BlockSpec((None, bs, G, D), lambda b, h, l, s: (b, s, h, 0))
    o_spec = pl.BlockSpec((None, bl, G, D), lambda b, h, l, s: (b, l, h, 0))

    out = pl.pallas_call(
        functools.partial(_cross_attn_kernel, scale=scale, gate_dtype=gate_dtype),
        out_shape=jax.ShapeDtypeStruct((B, L, H, D), q1.dtype),
        grid_spec=pltpu.PrefetchScalarGridSpec(
            num_scalar_prefetch=0,
            grid=(B, H // G, L // bl, S // bs),
            in_specs=[q_spec, k_spec, q_spec, k_spec, v_spec],
            out_specs=o_spec,
            scratch_shapes=[
                pltpu.VMEM((G, bl, D), jnp.float32),   # S-axis accumulator
                pltpu.VMEM((G, bl, E), q1.dtype),      # scaled / head-major q1
                pltpu.VMEM((G, bl, E), q2.dtype),      # scaled / head-major q2
            ],
        ),
        compiler_params=pltpu.CompilerParams(
            dimension_semantics=("parallel", "parallel", "parallel", "arbitrary"),
            vmem_limit_bytes=vmem_bytes,
        ),
    )(q1, k1, q2, k2, v1)
    return out, None


def _reference(q1, k1, v1, q2, k2, scale):
    hp = lax.Precision.HIGHEST
    s1 = jnp.einsum('blhe,bshe->bhls', q1, k1, precision=hp)
    s2 = jnp.einsum('blhe,bshe->bhls', q2, k2, precision=hp)
    a = jnp.tanh(s1 * scale) * jax.nn.sigmoid(s2 * scale)
    return jnp.einsum('bhls,bshd->blhd', a, v1, precision=hp)


if __name__ == "__main__":
    B, L, S, H, E, D = 2, 16, 16, 2, 32, 32

    key = jax.random.PRNGKey(0)
    ks = jax.random.split(key, 6)
    q1 = jax.random.normal(ks[0], (B, L, H, E), jnp.float32)
    k1 = jax.random.normal(ks[1], (B, S, H, E), jnp.float32)
    v1 = jax.random.normal(ks[2], (B, S, H, D), jnp.float32)
    q2 = jax.random.normal(ks[3], (B, L, H, E), jnp.float32)
    k2 = jax.random.normal(ks[4], (B, S, H, E), jnp.float32)
    v2 = jax.random.normal(ks[5], (B, S, H, D), jnp.float32)

    out, attn = cross_attention(q1, k1, v1, q2, k2, v2, attn_mask=None)
    out = jax.block_until_ready(out)
    assert attn is None
    assert out.shape == (B, L, H, D)

    ref = _reference(q1, k1, v1, q2, k2, 1.0 / sqrt(E))
    max_err = float(jnp.max(jnp.abs(out - ref)))
    assert jnp.allclose(out, ref, atol=1e-3, rtol=1e-3), f"max abs err {max_err}"

    print("KERNEL_OK")
</pallas_src>

<mosaic_0001>
module attributes {stable_mosaic.version = 11 : i64} {
  func.func @_cross_attn_kernel(%arg0: i32, %arg1: i32, %arg2: i32, %arg3: i32, %arg4: memref<1x16x2x32xf32, #tpu.memory_space<vmem>>, %arg5: memref<1x16x2x32xf32, #tpu.memory_space<vmem>>, %arg6: memref<1x16x2x32xf32, #tpu.memory_space<vmem>>, %arg7: memref<1x16x2x32xf32, #tpu.memory_space<vmem>>, %arg8: memref<1x16x2x32xf32, #tpu.memory_space<vmem>>, %arg9: memref<1x16x2x32xf32, #tpu.memory_space<vmem>>, %arg10: memref<2x16x32xf32, #tpu.memory_space<vmem>>, %arg11: memref<2x16x32xf32, #tpu.memory_space<vmem>>, %arg12: memref<2x16x32xf32, #tpu.memory_space<vmem>>) attributes {dimension_semantics = [#tpu.dimension_semantics<parallel>, #tpu.dimension_semantics<parallel>, #tpu.dimension_semantics<parallel>, #tpu.dimension_semantics<arbitrary>], iteration_bounds = array<i64: 2, 1, 1, 1>, scalar_prefetch = 0 : i64, scratch_operands = 3 : i64, tpu.core_type = #tpu.core_type<tc>, window_params = [{transform_indices = @transform_0, window_bounds = array<i64: 1, 16, 2, 32>}, {transform_indices = @transform_1, window_bounds = array<i64: 1, 16, 2, 32>}, {transform_indices = @transform_2, window_bounds = array<i64: 1, 16, 2, 32>}, {transform_indices = @transform_3, window_bounds = array<i64: 1, 16, 2, 32>}, {transform_indices = @transform_4, window_bounds = array<i64: 1, 16, 2, 32>}, {transform_indices = @transform_5, window_bounds = array<i64: 1, 16, 2, 32>}]} {
    %c0_i32 = arith.constant 0 : i32
    %0 = arith.cmpi eq, %arg3, %c0_i32 : i32
    %1 = arith.extui %0 : i1 to i32
    %c0_i32_0 = arith.constant 0 : i32
    %2 = arith.cmpi ne, %1, %c0_i32_0 : i32
    scf.if %2 {
      %cst_30 = arith.constant 0.000000e+00 : f32
      %27 = vector.broadcast %cst_30 : f32 to vector<2x16x32xf32>
      %c0_31 = arith.constant 0 : index
      %c0_32 = arith.constant 0 : index
      %c0_33 = arith.constant 0 : index
      %28 = vector.load %arg10[%c0_31, %c0_32, %c0_33] : memref<2x16x32xf32, #tpu.memory_space<vmem>>, vector<2x16x32xf32>
      tpu.vector_store %arg10[%c0_31, %c0_32, %c0_33], %27 {strides = array<i32>} : memref<2x16x32xf32, #tpu.memory_space<vmem>>, vector<2x16x32xf32>,
      %c0_34 = arith.constant 0 : index
      %c0_35 = arith.constant 0 : index
      %c0_36 = arith.constant 0 : index
      %c0_37 = arith.constant 0 : index
      %29 = vector.load %arg4[%c0_34, %c0_35, %c0_36, %c0_37] : memref<1x16x2x32xf32, #tpu.memory_space<vmem>>, vector<1x16x2x32xf32>
      %30 = vector.shape_cast %29 : vector<1x16x2x32xf32> to vector<16x2x32xf32>
      %31 = tpu.transpose %30, [1, 0, 2] : vector<16x2x32xf32> -> vector<2x16x32xf32>
      %cst_38 = arith.constant 0.176776692 : f32
      %32 = vector.broadcast %cst_38 : f32 to vector<2x16x32xf32>
      %33 = arith.mulf %31, %32 : vector<2x16x32xf32>
      %c0_39 = arith.constant 0 : index
      %c0_40 = arith.constant 0 : index
      %c0_41 = arith.constant 0 : index
      %34 = vector.load %arg11[%c0_39, %c0_40, %c0_41] : memref<2x16x32xf32, #tpu.memory_space<vmem>>, vector<2x16x32xf32>
      tpu.vector_store %arg11[%c0_39, %c0_40, %c0_41], %33 {strides = array<i32>} : memref<2x16x32xf32, #tpu.memory_space<vmem>>, vector<2x16x32xf32>,
      %c0_42 = arith.constant 0 : index
      %c0_43 = arith.constant 0 : index
      %c0_44 = arith.constant 0 : index
      %c0_45 = arith.constant 0 : index
      %35 = vector.load %arg6[%c0_42, %c0_43, %c0_44, %c0_45] : memref<1x16x2x32xf32, #tpu.memory_space<vmem>>, vector<1x16x2x32xf32>
      %36 = vector.shape_cast %35 : vector<1x16x2x32xf32> to vector<16x2x32xf32>
      %37 = tpu.transpose %36, [1, 0, 2] : vector<16x2x32xf32> -> vector<2x16x32xf32>
      %cst_46 = arith.constant 0.0883883461 : f32
      %38 = vector.broadcast %cst_46 : f32 to vector<2x16x32xf32>
      %39 = arith.mulf %37, %38 : vector<2x16x32xf32>
      %c0_47 = arith.constant 0 : index
      %c0_48 = arith.constant 0 : index
      %c0_49 = arith.constant 0 : index
      %40 = vector.load %arg12[%c0_47, %c0_48, %c0_49] : memref<2x16x32xf32, #tpu.memory_space<vmem>>, vector<2x16x32xf32>
      tpu.vector_store %arg12[%c0_47, %c0_48, %c0_49], %39 {strides = array<i32>} : memref<2x16x32xf32, #tpu.memory_space<vmem>>, vector<2x16x32xf32>,
    } else {
    }
    %c0 = arith.constant 0 : index
    %c0_1 = arith.constant 0 : index
    %c0_2 = arith.constant 0 : index
    %c0_3 = arith.constant 0 : index
    %3 = vector.load %arg5[%c0, %c0_1, %c0_2, %c0_3] : memref<1x16x2x32xf32, #tpu.memory_space<vmem>>, vector<1x16x2x32xf32>
    %4 = vector.shape_cast %3 : vector<1x16x2x32xf32> to vector<16x2x32xf32>
    %c0_4 = arith.constant 0 : index
    %c0_5 = arith.constant 0 : index
    %c0_6 = arith.constant 0 : index
    %c0_7 = arith.constant 0 : index
    %5 = vector.load %arg7[%c0_4, %c0_5, %c0_6, %c0_7] : memref<1x16x2x32xf32, #tpu.memory_space<vmem>>, vector<1x16x2x32xf32>
    %6 = vector.shape_cast %5 : vector<1x16x2x32xf32> to vector<16x2x32xf32>
    %c0_8 = arith.constant 0 : index
    %c0_9 = arith.constant 0 : index
    %c0_10 = arith.constant 0 : index
    %c0_11 = arith.constant 0 : index
    %7 = vector.load %arg8[%c0_8, %c0_9, %c0_10, %c0_11] : memref<1x16x2x32xf32, #tpu.memory_space<vmem>>, vector<1x16x2x32xf32>
    %8 = vector.shape_cast %7 : vector<1x16x2x32xf32> to vector<16x2x32xf32>
    %c0_12 = arith.constant 0 : index
    %c0_13 = arith.constant 0 : index
    %c0_14 = arith.constant 0 : index
    %9 = vector.load %arg11[%c0_12, %c0_13, %c0_14] : memref<2x16x32xf32, #tpu.memory_space<vmem>>, vector<2x16x32xf32>
    "tpu.trace_start"() <{level = 10 : i32, message = "gle,sge->gls"}> : () -> ()
    %cst = arith.constant dense<0.000000e+00> : vector<2x16x16xf32>
    %10 = tpu.matmul %9, %4, %cst {dimension_numbers = #tpu.dot_dimension_numbers<[2], [2], [1], [0], [0, 0, 0, 1, 1, 0], [0], [1]>} : vector<2x16x32xf32>, vector<16x2x32xf32>, vector<2x16x16xf32> -> vector<2x16x16xf32>
    "tpu.trace_stop"() : () -> ()
    %c0_15 = arith.constant 0 : index
    %c0_16 = arith.constant 0 : index
    %c0_17 = arith.constant 0 : index
    %11 = vector.load %arg12[%c0_15, %c0_16, %c0_17] : memref<2x16x32xf32, #tpu.memory_space<vmem>>, vector<2x16x32xf32>
    "tpu.trace_start"() <{level = 10 : i32, message = "gle,sge->gls"}> : () -> ()
    %cst_18 = arith.constant dense<0.000000e+00> : vector<2x16x16xf32>
    %12 = tpu.matmul %11, %6, %cst_18 {dimension_numbers = #tpu.dot_dimension_numbers<[2], [2], [1], [0], [0, 0, 0, 1, 1, 0], [0], [1]>} : vector<2x16x32xf32>, vector<16x2x32xf32>, vector<2x16x16xf32> -> vector<2x16x16xf32>
    "tpu.trace_stop"() : () -> ()
    %13 = math.tanh %10 : vector<2x16x16xf32>
    %14 = math.tanh %12 : vector<2x16x16xf32>
    %cst_19 = arith.constant 5.000000e-01 : f32
    %15 = vector.broadcast %cst_19 : f32 to vector<2x16x16xf32>
    %16 = arith.mulf %14, %15 : vector<2x16x16xf32>
    %cst_20 = arith.constant 5.000000e-01 : f32
    %17 = vector.broadcast %cst_20 : f32 to vector<2x16x16xf32>
    %18 = arith.addf %16, %17 : vector<2x16x16xf32>
    %19 = arith.mulf %13, %18 : vector<2x16x16xf32>
    %c0_21 = arith.constant 0 : index
    %c0_22 = arith.constant 0 : index
    %c0_23 = arith.constant 0 : index
    %20 = vector.load %arg10[%c0_21, %c0_22, %c0_23] : memref<2x16x32xf32, #tpu.memory_space<vmem>>, vector<2x16x32xf32>
    "tpu.trace_start"() <{level = 10 : i32, message = "gls,sgd->gld"}> : () -> ()
    %cst_24 = arith.constant dense<0.000000e+00> : vector<2x16x32xf32>
    %21 = tpu.matmul %19, %8, %cst_24 {dimension_numbers = #tpu.dot_dimension_numbers<[2], [0], [1], [2], [0, 0, 0, 1, 1, 2], [0], [1]>} : vector<2x16x16xf32>, vector<16x2x32xf32>, vector<2x16x32xf32> -> vector<2x16x32xf32>
    "tpu.trace_stop"() : () -> ()
    %22 = arith.addf %20, %21 : vector<2x16x32xf32>
    %c0_25 = arith.constant 0 : index
    %c0_26 = arith.constant 0 : index
    %c0_27 = arith.constant 0 : index
    %23 = vector.load %arg10[%c0_25, %c0_26, %c0_27] : memref<2x16x32xf32, #tpu.memory_space<vmem>>, vector<2x16x32xf32>
    tpu.vector_store %arg10[%c0_25, %c0_26, %c0_27], %22 {strides = array<i32>} : memref<2x16x32xf32, #tpu.memory_space<vmem>>, vector<2x16x32xf32>,
    %c0_i32_28 = arith.constant 0 : i32
    %24 = arith.cmpi eq, %arg3, %c0_i32_28 : i32
    %25 = arith.extui %24 : i1 to i32
    %c0_i32_29 = arith.constant 0 : i32
    %26 = arith.cmpi ne, %25, %c0_i32_29 : i32
    scf.if %26 {
      %c0_30 = arith.constant 0 : index
      %c0_31 = arith.constant 0 : index
      %c0_32 = arith.constant 0 : index
      %27 = vector.load %arg10[%c0_30, %c0_31, %c0_32] : memref<2x16x32xf32, #tpu.memory_space<vmem>>, vector<2x16x32xf32>
      %28 = tpu.transpose %27, [1, 0, 2] : vector<2x16x32xf32> -> vector<16x2x32xf32>
      %c0_33 = arith.constant 0 : index
      %c0_34 = arith.constant 0 : index
      %c0_35 = arith.constant 0 : index
      %c0_36 = arith.constant 0 : index
      %29 = vector.load %arg9[%c0_33, %c0_34, %c0_35, %c0_36] : memref<1x16x2x32xf32, #tpu.memory_space<vmem>>, vector<1x16x2x32xf32>
      %30 = vector.shape_cast %29 : vector<1x16x2x32xf32> to vector<16x2x32xf32>
      %31 = vector.shape_cast %28 : vector<16x2x32xf32> to vector<1x16x2x32xf32>
      tpu.vector_store %arg9[%c0_33, %c0_34, %c0_35, %c0_36], %31 {strides = array<i32>} : memref<1x16x2x32xf32, #tpu.memory_space<vmem>>, vector<1x16x2x32xf32>,
    } else {
    }
    return
  }
  func.func @transform_0(%arg0: i32, %arg1: i32, %arg2: i32, %arg3: i32) -> (i32, i32, i32, i32) {
    %c0_i32 = arith.constant 0 : i32
    %c0_i32_0 = arith.constant 0 : i32
    return %arg0, %arg2, %arg1, %c0_i32 : i32, i32, i32, i32
  }
  func.func @transform_1(%arg0: i32, %arg1: i32, %arg2: i32, %arg3: i32) -> (i32, i32, i32, i32) {
    %c0_i32 = arith.constant 0 : i32
    %c0_i32_0 = arith.constant 0 : i32
    return %arg0, %arg3, %arg1, %c0_i32 : i32, i32, i32, i32
  }
  func.func @transform_2(%arg0: i32, %arg1: i32, %arg2: i32, %arg3: i32) -> (i32, i32, i32, i32) {
    %c0_i32 = arith.constant 0 : i32
    %c0_i32_0 = arith.constant 0 : i32
    return %arg0, %arg2, %arg1, %c0_i32 : i32, i32, i32, i32
  }
  func.func @transform_3(%arg0: i32, %arg1: i32, %arg2: i32, %arg3: i32) -> (i32, i32, i32, i32) {
    %c0_i32 = arith.constant 0 : i32
    %c0_i32_0 = arith.constant 0 : i32
    return %arg0, %arg3, %arg1, %c0_i32 : i32, i32, i32, i32
  }
  func.func @transform_4(%arg0: i32, %arg1: i32, %arg2: i32, %arg3: i32) -> (i32, i32, i32, i32) {
    %c0_i32 = arith.constant 0 : i32
    %c0_i32_0 = arith.constant 0 : i32
    return %arg0, %arg3, %arg1, %c0_i32 : i32, i32, i32, i32
  }
  func.func @transform_5(%arg0: i32, %arg1: i32, %arg2: i32, %arg3: i32) -> (i32, i32, i32, i32) {
    %c0_i32 = arith.constant 0 : i32
    %c0_i32_0 = arith.constant 0 : i32
    return %arg0, %arg2, %arg1, %c0_i32 : i32, i32, i32, i32
  }
}

</mosaic_0001>

<bundles_post_ra>
// kernel: tpu_custom_call.1
= control target key start
LH: loop header
LB: loop body
LE: loop exit
PB: predicated region body
PF: predicated region fallthrough
CT: control target
= control target key end

     0   :  { %s9726_s0 = inlined_call_operand.hbm [shape: f32[2,16,2,32], index: 0, kind: input, shape index: {}]   ;;  %s9727_s1 = inlined_call_operand.hbm [shape: f32[2,16,2,32], index: 1, kind: input, shape index: {}]   ;;  %s9728_s2 = inlined_call_operand.hbm [shape: f32[2,16,2,32], index: 2, kind: input, shape index: {}]   ;;  %s9729_s3 = inlined_call_operand.hbm [shape: f32[2,16,2,32], index: 3, kind: input, shape index: {}]   ;;  %s9730_s4 = inlined_call_operand.hbm [shape: f32[2,16,2,32], index: 4, kind: input, shape index: {}]   ;;  %s9731_s5 = inlined_call_operand.hbm [shape: f32[2,16,2,32], index: 5, kind: output, shape index: {}]  }
   0x1   :  { %9797 = sst [smem:[#allocation61_spill]] %s9727_s1 }
   0x2   :  { %9798 = sst [smem:[#allocation62_spill]] %s9729_s3 }
   0x3   :  { %9799 = sst [smem:[#allocation63_spill]] %s9731_s5 }
   0x4   :  { %10 = vsyncpa [#allocation6], 0 }
   0x5   :  { %12 = vsyncpa [#allocation6 + $0x1], 0 }
   0x6   :  { %13 = vsyncpa [#allocation9], 0 }
   0x7   :  { %15 = vsyncpa [#allocation9 + $0x1], 0 }
   0x8   :  { %16 = vsyncpa [#allocation12], 0 }
   0x9   :  { %18 = vsyncpa [#allocation12 + $0x1], 0 }
   0xa   :  { %19 = vsyncpa [#allocation7], 0 }
   0xb   :  { %21 = vsyncpa [#allocation7 + $0x1], 0  ;;  %s7984_s18 = smov 0   ;;  %s7986_s19 = smov 0  }
   0xc   :  { %s7988_s20 = smov 0   ;;  %s7990_s21 = smov 0  }
   0xd   :  { %s7992_s22 = smov 0   ;;  %s7994_s23 = smov 0  }
   0xe LB: > { %9800 = sst [smem:[#allocation19_spill]] %s7919_s18  ;;  %s8015_s24 = sadd.s32 4294967295, %s7939_s23   ;;  %s7939_s23 = sphi %s7994_s23, %s27_s23   ;;  %s7935_s22 = sphi %s7992_s22, %s9976_s22   ;;  %s7931_s21 = sphi %s7990_s21, %s9975_s21   ;;  %s7927_s20 = sphi %s7988_s20, %s9979_s20   ;;  %s7923_s19 = sphi %s7986_s19, %s9978_s19   ;;  %s7919_s18 = sphi %s7984_s18, %s9977_s18  }
   0xf   : > { %9801 = sst [smem:[#allocation20_spill]] %s7935_s22  ;;  %s7420_s25 = sadd.s32 4294967294, %s7939_s23  }
  0x10   : > { %9802 = sst [smem:[#allocation21_spill]] %s7939_s23  ;;  %s53_s26 = sadd.s32 1, %s7935_s22 }
  0x11   : > { %s64_s27 = sadd.s32 1, %s7927_s20  ;;  %p55_p0 = scmp.ge.s32.totalorder %s53_s26, 2 }
  0x12   : > { %p71_p1 = scmp.ne.s32.totalorder %s7927_s20, %s7923_s19  ;;  %p72_p2 = scmp.eq.s32.totalorder %s7939_s23, 0 }
  0x13   : > { %p77_p3 = scmp.ne.s32.totalorder %s7923_s19, %s7919_s18  ;;  %s9981_s26 = smov (%p55_p0, %s53_s26), 0 }
  0x14   : > { %9803 = sst [smem:[#allocation22_spill]] %s9981_s26  ;;  %p8027_p4 = por %p72_p2, %p71_p1 }
  0x15   : > { %p78_p5 = scmp.eq.s32.totalorder %s8015_s24, 0  ;;  %s57_s29 = ssub.s32 %s7935_s22, %s9981_s26 }
  0x16   : > { %p225_p6 = scmp.eq.s32.totalorder %s8015_s24, 1  ;;  %p62_p7 = scmp.eq.s32.totalorder %s57_s29, 0 }
  0x17   : > { %p8035_p8 = por %p78_p5, %p77_p3  ;;  %p231_p10 = scmp.eq.s32.totalorder %s7420_s25, 1 }
  0x18   : > { %p8039_p9 = por %p225_p6, %p71_p1  ;;  %p7590_p13 = scmp.lt.s32.totalorder %s7939_s23, 2 }
  0x19   : > { %s8044_s7 = scalar_select %p62_p7, %s7927_s20, %s64_s27  }
  0x1a   : > { %p8046_p11 = por %p231_p10, %p77_p3  ;;  %s9732_s9 = sand.u32 1, %s7927_s20  }
  0x1b   : > { %9807 = sst [smem:[#allocation23_spill]] %s8044_s7  ;;  %s8055_s10 = sshll.u32 %s9732_s9, 5 }
  0x1c   : > { %s9808_s8 = scalar_select %p8046_p11, 1, 0 }
  0x1d   : > { %s8058_s11 = sshll.u32 %s7935_s22, 9  ;;  %p8062_p0 = pnand %p7590_p13, %p8027_p4 }
  0x1e   : > { %9809 = sst [smem:[#allocation24_spill]] %s9808_s8  ;;  %s9733_s13 = sand.u32 1, %s7939_s23  }
  0x1f   : > { %s9811_s1 = sld [smem:[#allocation61_spill]]  ;;  %s279_s17 = scalar_lea.vmem [#allocation8], %s8055_s10 }
  0x20   : > { %s289_s25 = sshll.u32 %s279_s17, 4  ;;  %p7438_p1 = scmp.ge.s32.totalorder %s7939_s23, 1  ;;  %s290_s25 = int_to_ptr.vmem [resolvable:$true] %s289_s25 }
  0x21   : > { %p369_p2 = scmp.lt.s32.totalorder %s7939_s23, 3  ;;  %s8076_s27 = scalar_lea.sflag [#allocation9], %s9733_s13 }
  0x22   : > { %p8080_p3 = pneg %p8062_p0  ;;  %s7724_s29 = scalar_lea.vmem %s290_s25, 512 }
  0x23   : > { %p7725_p4 = scmp.ne.s32.totalorder %s290_s25, %s7724_s29  ;;  %s7941_s14 = smov [#allocation8]  }
  0x24   : > { %s7729_s15 = sshll.u32 %s7941_s14, 4  ;;  %s7730_s15 = int_to_ptr.vmem [resolvable:$false] %s7729_s15 }
  0x25   : > { %s288_s16 = scalar_lea.hbm %s9811_s1, %s8058_s11  ;;  %p7727_p5 = pnand %p7725_p4, %p8080_p3 }
  0x26   : > { %s7731_s17 = scalar_lea.vmem %s7730_s15, 1024  ;;  %p7732_p7 = scmp.lt.s32.totalorder %s290_s25, %s7730_s15 }
  0x27   : > { %p7728_p6 = pneg %p7727_p5  ;;  %p7733_p10 = scmp.lt.s32.totalorder %s7731_s17, %s7724_s29 }
  0x29   : > { %p7734_p13 = por %p7733_p10, %p7732_p7 }
  0x2b   : > { %p7735_p12 = pnand %p7734_p13, %p7728_p6 }
  0x2d   : > { %7738 = shalt.err (!%p7735_p12)
}
  0x2e   : > { %s9737_s9 = smov 32   ;;  %s7943_s13 = smov 2  }
  0x2f   : > { %7576 = dma.hbm_to_vmem [thread:$0]  (!%p8062_p0), %s288_s16, 512, %s290_s25, %s8076_s27, %s9737_s9, %s9737_s9, %s7943_s13  }
  0x30   : > { %p8096_p4 = pnand %p7438_p1, %p369_p2  ;;  %s9814_s3 = sld [smem:[#allocation62_spill]] }
  0x31   : > { %s327_s1 = scalar_lea.vmem [#allocation11], %s8055_s10  ;;  %s9815_s22 = sand.u32 1, %s7939_s23  }
  0x32   : > { %s337_s26 = sshll.u32 %s327_s1, 4  ;;  %s8107_s7 = scalar_lea.sflag [#allocation12], %s9815_s22  ;;  %s338_s26 = int_to_ptr.vmem [resolvable:$true] %s337_s26 }
  0x33   : > { %s7752_s8 = scalar_lea.vmem %s338_s26, 512  ;;  %s7944_s16 = smov [#allocation11]  }
  0x34   : > { %p7753_p12 = scmp.ne.s32.totalorder %s338_s26, %s7752_s8  ;;  %s7757_s25 = sshll.u32 %s7944_s16, 4  ;;  %s7758_s25 = int_to_ptr.vmem [resolvable:$false] %s7757_s25 }
  0x35   : > { %s7759_s9 = scalar_lea.vmem %s7758_s25, 1024  ;;  %p7760_p1 = scmp.lt.s32.totalorder %s338_s26, %s7758_s25 }
  0x36   : > { %s336_s17 = scalar_lea.hbm %s9814_s3, %s8058_s11  ;;  %p7755_p5 = pnand %p7753_p12, %p8080_p3 }
  0x37   : > { %p7761_p2 = scmp.lt.s32.totalorder %s7759_s9, %s7752_s8 }
  0x38   : > { %p7756_p6 = pneg %p7755_p5 }
  0x39   : > { %p7762_p7 = por %p7761_p2, %p7760_p1 }
  0x3b   : > { %p7763_p10 = pnand %p7762_p7, %p7756_p6 }
  0x3d   : > { %7766 = shalt.err (!%p7763_p10)
}
  0x3e   : > { %s9816_s1 = smov 32   ;;  %s264_s15 = scalar_lea.hbm %s9726_s0, %s8058_s11 }
  0x3f   : > { %7582 = dma.hbm_to_vmem [thread:$0]  (!%p8062_p0), %s336_s17, 512, %s338_s26, %s8107_s7, %s9816_s1, %s9816_s1, %s7943_s13  }
  0x40   : > { %s255_s16 = scalar_lea.vmem [#allocation5], %s8055_s10  ;;  %s9817_s9 = sand.u32 1, %s7927_s20  }
  0x41   : > { %s265_s8 = sshll.u32 %s255_s16, 4  ;;  %s252_s25 = scalar_lea.sflag [#allocation6], %s9817_s9  ;;  %s266_s8 = int_to_ptr.vmem [resolvable:$true] %s265_s8 }
  0x42   : > { %s7780_s3 = scalar_lea.vmem %s266_s8, 512  ;;  %s7945_s23 = smov [#allocation5]  }
  0x43   : > { %p7781_p13 = scmp.ne.s32.totalorder %s266_s8, %s7780_s3  ;;  %s7785_s18 = sshll.u32 %s7945_s23, 4  ;;  %s7786_s18 = int_to_ptr.vmem [resolvable:$false] %s7785_s18 }
  0x44   : > { %s7787_s5 = scalar_lea.vmem %s7786_s18, 1024  ;;  %p7788_p6 = scmp.lt.s32.totalorder %s266_s8, %s7786_s18 }
  0x45   : > { %p7783_p12 = pnand %p7781_p13, %p8080_p3  ;;  %p7789_p1 = scmp.lt.s32.totalorder %s7787_s5, %s7780_s3 }
  0x47   : > { %p7784_p5 = pneg %p7783_p12  ;;  %p7790_p2 = por %p7789_p1, %p7788_p6 }
  0x49   : > { %p7791_p7 = pnand %p7790_p2, %p7784_p5 }
  0x4b   : > { %7794 = shalt.err (!%p7791_p7)
}
  0x4c   : > { %7573 = dma.hbm_to_vmem [thread:$0]  (!%p8062_p0), %s264_s15, 512, %s266_s8, %s252_s25, %s9816_s1, %s9816_s1, %s7943_s13  }
  0x4d   : > { %s312_s23 = scalar_lea.hbm %s9728_s2, %s8058_s11  ;;  %s303_s22 = scalar_lea.vmem [#allocation10], %s8055_s10 }
  0x4e   : > { %s313_s14 = sshll.u32 %s303_s22, 4  ;;  %s7946_s5 = smov [#allocation10]   ;;  %s314_s14 = int_to_ptr.vmem [resolvable:$true] %s313_s14 }
  0x4f   : > { %s7808_s3 = scalar_lea.vmem %s314_s14, 512  ;;  %s7813_s18 = sshll.u32 %s7946_s5, 4  ;;  %s7814_s18 = int_to_ptr.vmem [resolvable:$false] %s7813_s18 }
  0x50   : > { %p7809_p10 = scmp.ne.s32.totalorder %s314_s14, %s7808_s3  ;;  %s7815_s16 = scalar_lea.vmem %s7814_s18, 1024 }
  0x51   : > { %p7816_p5 = scmp.lt.s32.totalorder %s314_s14, %s7814_s18  ;;  %p7817_p6 = scmp.lt.s32.totalorder %s7815_s16, %s7808_s3 }
  0x52   : > { %p7811_p13 = pnand %p7809_p10, %p8080_p3 }
  0x53   : > { %p7818_p1 = por %p7817_p6, %p7816_p5 }
  0x54   : > { %p7812_p12 = pneg %p7811_p13 }
  0x56   : > { %p7819_p2 = pnand %p7818_p1, %p7812_p12 }
  0x58   : > { %7822 = shalt.err (!%p7819_p2)
}
  0x59   : > { %7579 = dma.hbm_to_vmem [thread:$0]  (!%p8062_p0), %s312_s23, 512, %s314_s14, %s8076_s27, %s9816_s1, %s9816_s1, %s7943_s13  }
  0x5a   : > { %s360_s9 = scalar_lea.hbm %s9730_s4, %s8058_s11  ;;  %s351_s25 = scalar_lea.vmem [#allocation13], %s8055_s10 }
  0x5b   : > { %s361_s26 = sshll.u32 %s351_s25, 4  ;;  %s7947_s22 = smov [#allocation13]   ;;  %s362_s26 = int_to_ptr.vmem [resolvable:$true] %s361_s26 }
  0x5c   : > { %s7836_s17 = scalar_lea.vmem %s362_s26, 512  ;;  %s7841_s3 = sshll.u32 %s7947_s22, 4  ;;  %s7842_s3 = int_to_ptr.vmem [resolvable:$false] %s7841_s3 }
  0x5d   : > { %p7837_p7 = scmp.ne.s32.totalorder %s362_s26, %s7836_s17  ;;  %s7843_s5 = scalar_lea.vmem %s7842_s3, 1024 }
  0x5e   : > { %p7844_p12 = scmp.lt.s32.totalorder %s362_s26, %s7842_s3  ;;  %p7845_p5 = scmp.lt.s32.totalorder %s7843_s5, %s7836_s17 }
  0x5f   : > { %p7839_p10 = pnand %p7837_p7, %p8080_p3 }
  0x60   : > { %p7846_p6 = por %p7845_p5, %p7844_p12 }
  0x61   : > { %p7840_p13 = pneg %p7839_p10 }
  0x63   : > { %p7847_p1 = pnand %p7846_p6, %p7840_p13 }
  0x65   : > { %7850 = shalt.err (!%p7847_p1)
}
  0x66   : > { %7585 = dma.hbm_to_vmem [thread:$0]  (!%p8062_p0), %s360_s9, 512, %s362_s26, %s8107_s7, %s9816_s1, %s9816_s1, %s7943_s13  }
  0x67   : > { %373 = sbr.rel (%p8096_p4) target bundleno = 1211 (0x4bb), region = 40 }
  0x6c   : > { %s8160_s10 = sand.u32 1, %s7923_s19  }
  0x6d   : > { %s8163_s11 = sshll.u32 %s8160_s10, 5  ;;  %s376_s27 = scalar_lea.sflag [#allocation6], %s8160_s10 }
  0x6e   : > { %s8167_s28 = scalar_lea.vmem [#allocation5], %s8163_s11 }
  0x6f   : > { %7902 = dma.done.wait (%p8035_p8), %s376_s27, 512  }
  0x70   : > { %7904 = vsyncadd (%p8035_p8), %s376_s27, 4294966784  ;;  %s384_s7 = sand.u32 1, %s8015_s24   ;;  %s8175_s13 = scalar_lea.vmem [#allocation8], %s8163_s11 }
  0x71   : > { %s385_s12 = scalar_lea.sflag [#allocation9], %s384_s7 }
  0x72   : > { %7906 = dma.done.wait (%p8035_p8), %s385_s12, 1024  }
  0x73   : > { %7908 = vsyncadd (%p8035_p8), %s385_s12, 4294966272  ;;  %s8182_s29 = scalar_lea.vmem [#allocation10], %s8163_s11  ;;  %s403_s1 = scalar_lea.sflag [#allocation12], %s384_s7 }
  0x74   : > { %s8185_s23 = scalar_lea.vmem [#allocation11], %s8163_s11 }
  0x75   : > { %7910 = dma.done.wait (%p8035_p8), %s403_s1, 1024  }
  0x76   : > { %7912 = vsyncadd (%p8035_p8), %s403_s1, 4294966272  ;;  %v727_v0 = vld [vmem:[%s8175_s13 + $0x4] sm:$0x3]  ;;  %v725_v1 = vld [vmem:[%s8175_s13] sm:$0x3]  ;;  %v497_v32 = vlaneseq  ;;  %vm472_vm0 = vcmask 261120  }
  0x77   : > { %841 = vxpose.xlu1.b32.start.end [1/1] (short) (narrow) %v727_v0, 32  ;;  %777 = vxpose.xlu0.b32.start.end [1/1] (short) (narrow) %v725_v1, 32  ;;  %v728_v2 = vld [vmem:[%s8175_s13 + $0x6] sm:$0x3]  ;;  %v726_v3 = vld [vmem:[%s8175_s13 + $0x2] sm:$0x3] }
  0x78   : > { %v730_v4 = vld [vmem:[%s8175_s13 + $0xa] sm:$0x3]  ;;  %v729_v5 = vld [vmem:[%s8175_s13 + $0x8] sm:$0x3]  ;;  %v732_v6 = vld [vmem:[%s8175_s13 + $0xe] sm:$0x3] }
  0x79   : > { %v731_v7 = vld [vmem:[%s8175_s13 + $0xc] sm:$0x3]  ;;  %v734_v8 = vld [vmem:[%s8175_s13 + $0x12] sm:$0x3]  ;;  %v733_v9 = vld [vmem:[%s8175_s13 + $0x10] sm:$0x3] }
  0x7a   : > { %v736_v10 = vld [vmem:[%s8175_s13 + $0x16] sm:$0x3]  ;;  %v735_v11 = vld [vmem:[%s8175_s13 + $0x14] sm:$0x3]  ;;  %v738_v12 = vld [vmem:[%s8175_s13 + $0x1a] sm:$0x3] }
  0x7b   : > { %v737_v13 = vld [vmem:[%s8175_s13 + $0x18] sm:$0x3]  ;;  %v740_v14 = vld [vmem:[%s8175_s13 + $0x1e] sm:$0x3]  ;;  %v739_v15 = vld [vmem:[%s8175_s13 + $0x1c] sm:$0x3] }
  0x7c   : > { %v742_v16 = vld [vmem:[%s8185_s23 + $0x2] sm:$0x3]  ;;  %v741_v17 = vld [vmem:[%s8185_s23] sm:$0x3]  ;;  %v744_v18 = vld [vmem:[%s8185_s23 + $0x6] sm:$0x3] }
  0x7d   : > { %v743_v19 = vld [vmem:[%s8185_s23 + $0x4] sm:$0x3]  ;;  %v746_v24 = vld [vmem:[%s8185_s23 + $0xa] sm:$0x3]  ;;  %v745_v25 = vld [vmem:[%s8185_s23 + $0x8] sm:$0x3] }
  0x7e   : > { %v7948_v30 = vmov 1983009808   ;;  %v8213_v38 = vshrl.u32 %v497_v32, 7  ;;  %v748_v45 = vld [vmem:[%s8185_s23 + $0xe] sm:$0x3]  ;;  %s415_s24 = scalar_lea.vmem [#allocation13], %s8163_s11 }
  0x7f   : > { %v495_v31 = vunpack.c.l.s4 %v7948_v30  ;;  %v747_v46 = vld [vmem:[%s8185_s23 + $0xc] sm:$0x3]  ;;  %v7949_v30 = vmov 1934713408   ;;  %vm6878_vm1 = vcmask 130048   ;;  %vm7188_vm2 = vcmask 254976  }
  0x80   : > { %s9627_s30 = scalar_lea.vmem [#allocation14], %s8163_s11  ;;  %s7467_s14 = sshll.u32 %s7931_s21, 9 }
  0x81   : > { %v496_v37 = vunpack.c.0.s8 %v495_v31  ;;  %v527_v31 = vunpack.c.l.s4 %v7949_v30  ;;  %s7222_s18 = sshll.u32 %s9627_s30, 4  ;;  %s9969_s15 = sld [smem:[#allocation63_spill]]  ;;  %s9664_s18 = int_to_ptr.vmem [resolvable:$true] %s7222_s18 }
  0x82   : > { %s7206_s9 = scalar_lea.sflag [#allocation7], %s8160_s10  ;;  %s7851_s25 = scalar_lea.vmem %s9664_s18, 512 }
  0x83   : > { %v8222_v42 = vsub.s32 %v496_v37, %v8213_v38  ;;  %p7852_p8 = scmp.ne.s32.totalorder %s9664_s18, %s7851_s25  ;;  %s7951_s26 = smov [#allocation14]  }
  0x84   : > { %873 = vxpose.xlu1.b32.start.end [1/1] (short) (narrow) %v728_v2, 32  ;;  %809 = vxpose.xlu0.b32.start.end [1/1] (short) (narrow) %v726_v3, 32  ;;  %s7855_s17 = sshll.u32 %s7951_s26, 4  ;;  %s7856_s17 = int_to_ptr.vmem [resolvable:$false] %s7855_s17 }
  0x85   : > { %p7853_p0 = pnand %p7852_p8, %p8039_p9  ;;  %s7857_s22 = scalar_lea.vmem %s7856_s17, 1024 }
  0x86   : > { %p7858_p4 = scmp.lt.s32.totalorder %s9664_s18, %s7856_s17  ;;  %p7859_p2 = scmp.lt.s32.totalorder %s7857_s22, %s7851_s25 }
  0x87   : > { %s9662_s8 = scalar_lea.hbm %s9969_s15, %s7467_s14  ;;  %p7854_p3 = pneg %p7853_p0 }
  0x88   : > { %p7860_p7 = por %p7859_p2, %p7858_p4 }
  0x8a   : > { %p7861_p10 = pnand %p7860_p7, %p7854_p3 }
  0x91   : > { %937 = vxpose.xlu1.b32.start.end [1/1] (short) (narrow) %v730_v4, 32  ;;  %905 = vxpose.xlu0.b32.start.end [1/1] (short) (narrow) %v729_v5, 32 }
  0x9e   : > { %1001 = vxpose.xlu1.b32.start.end [1/1] (short) (narrow) %v732_v6, 32  ;;  %969 = vxpose.xlu0.b32.start.end [1/1] (short) (narrow) %v731_v7, 32 }
  0xab   : > { %1065 = vxpose.xlu1.b32.start.end [1/1] (short) (narrow) %v734_v8, 32  ;;  %1033 = vxpose.xlu0.b32.start.end [1/1] (short) (narrow) %v733_v9, 32 }
  0xb8   : > { %1129 = vxpose.xlu1.b32.start.end [1/1] (short) (narrow) %v736_v10, 32  ;;  %1097 = vxpose.xlu0.b32.start.end [1/1] (short) (narrow) %v735_v11, 32 }
  0xc5   : > { %1193 = vxpose.xlu1.b32.start.end [1/1] (short) (narrow) %v738_v12, 32  ;;  %1161 = vxpose.xlu0.b32.start.end [1/1] (short) (narrow) %v737_v13, 32 }
  0xd2   : > { %1257 = vxpose.xlu1.b32.start.end [1/1] (short) (narrow) %v740_v14, 32  ;;  %1225 = vxpose.xlu0.b32.start.end [1/1] (short) (narrow) %v739_v15, 32 }
  0xdf   : > { %3800 = vxpose.xlu1.b32.start.end [1/1] (short) (narrow) %v742_v16, 32  ;;  %3768 = vxpose.xlu0.b32.start.end [1/1] (short) (narrow) %v741_v17, 32 }
  0xec   : > { %3864 = vxpose.xlu1.b32.start.end [1/1] (short) (narrow) %v744_v18, 32  ;;  %3832 = vxpose.xlu0.b32.start.end [1/1] (short) (narrow) %v743_v19, 32  ;;  %v750_v19 = vld [vmem:[%s8185_s23 + $0x12] sm:$0x3] }
  0xf3   : > { %v857_v20 = vpop.trf.xlu1  ;;  %v793_v21 = vpop.trf.xlu0 }
  0xf4   : > { %v1289_v22 = vcombine.low %v793_v21, %v857_v20  ;;  %v1290_v23 = vcombine.high %v793_v21, %v857_v20  ;;  %v749_v20 = vld [vmem:[%s8185_s23 + $0x10] sm:$0x3] }
  0xf6   : > { %v8227_v49 = vrot.slane %v1289_v22, %v8222_v42  ;;  %v8230_v50 = vrot.slane %v1290_v23, %v8222_v42 }
  0xf7   : > { %v858_v26 = vpop.trf.xlu1  ;;  %v794_v27 = vpop.trf.xlu0 }
  0xf8   : > { %v1561_v28 = vcombine.low %v794_v27, %v858_v26  ;;  %v1562_v29 = vcombine.high %v794_v27, %v858_v26 }
  0xf9   : > { %3928 = vxpose.xlu1.b32.start.end [1/1] (short) (narrow) %v746_v24, 32  ;;  %3896 = vxpose.xlu0.b32.start.end [1/1] (short) (narrow) %v745_v25, 32 }
  0xfa   : > { %v8247_v61 = vrot.slane %v1561_v28, %v8222_v42  ;;  %v8250_v62 = vrot.slane %v1562_v29, %v8222_v42 }
  0xfb   : > { %v859_v33 = vpop.trf.xlu1  ;;  %v795_v34 = vpop.trf.xlu0 }
  0xfc   : > { %v1833_v35 = vcombine.low %v795_v34, %v859_v33  ;;  %v1834_v36 = vcombine.high %v795_v34, %v859_v33  ;;  %v528_v34 = vunpack.c.0.s8 %v527_v31 }
  0xfe   : > { %v8267_v9 = vrot.slane %v1833_v35, %v8222_v42  ;;  %v8270_v10 = vrot.slane %v1834_v36, %v8222_v42  ;;  %v752_v35 = vld [vmem:[%s8185_s23 + $0x16] sm:$0x3]  ;;  %v751_v36 = vld [vmem:[%s8185_s23 + $0x14] sm:$0x3] }
  0xff   : > { %v8215_v39 = vpop.trf.xlu1  ;;  %v8217_v40 = vpop.trf.xlu0 }
 0x100   : > { %v2106_v41 = vcombine.high %v8217_v40, %v8215_v39  ;;  %v2105_v37 = vcombine.low %v8217_v40, %v8215_v39 }
 0x102   : > { %v8295_v22 = vrot.slane %v2106_v41, %v8222_v42 }
 0x103   : > { %v889_v43 = vpop.trf.xlu1  ;;  %v825_v44 = vpop.trf.xlu0 }
 0x104   : > { %v1305_v47 = vcombine.low %v825_v44, %v889_v43  ;;  %v1306_v48 = vcombine.high %v825_v44, %v889_v43  ;;  %v8317_v44 = vsub.s32 %v528_v34, %v8213_v38 }
 0x106   : > { %v8233_v51 = vrot.slane %v1305_v47, %v8222_v42  ;;  %v8236_v52 = vrot.slane %v1306_v48, %v8222_v42  ;;  %3992 = vxpose.xlu1.b32.start.end [1/1] (short) (narrow) %v748_v45, 32  ;;  %3960 = vxpose.xlu0.b32.start.end [1/1] (short) (narrow) %v747_v46, 32  ;;  %v8320_v45 = vrot.slane %v2105_v37, %v8222_v42 }
 0x107   : > { %v890_v53 = vpop.trf.xlu1  ;;  %v826_v54 = vpop.trf.xlu0 }
 0x108   : > { %v1353_v55 = vcombine.low %v8227_v49, %v8233_v51  ;;  %v1354_v56 = vcombine.high %v8227_v49, %v8233_v51  ;;  %v1369_v57 = vcombine.low %v8230_v50, %v8236_v52  ;;  %v1370_v58 = vcombine.high %v8230_v50, %v8236_v52 }
 0x109   : > { %v1577_v59 = vcombine.low %v826_v54, %v890_v53  ;;  %v1578_v60 = vcombine.high %v826_v54, %v890_v53 }
 0x10a   : > { %v8323_v48 = vrot.slane %v1353_v55, %v8317_v44  ;;  %v8329_v38 = vrot.slane %v1354_v56, %v8317_v44  ;;  %v8332_v52 = vrot.slane %v1369_v57, %v8317_v44  ;;  %v8335_v53 = vrot.slane %v1370_v58, %v8317_v44 }
 0x10b   : > { %v8253_v63 = vrot.slane %v1577_v59, %v8222_v42  ;;  %v8256_v0 = vrot.slane %v1578_v60, %v8222_v42  ;;  %v891_v1 = vpop.trf.xlu1  ;;  %v827_v2 = vpop.trf.xlu0 }
 0x10c   : > { %v1849_v3 = vcombine.low %v827_v2, %v891_v1  ;;  %v1850_v4 = vcombine.high %v827_v2, %v891_v1  ;;  %9818 = vst [vmem:[#allocation25_spill] sm:$0xff] %v8323_v48  ;;  %9819 = vst [vmem:[#allocation26_spill] sm:$0xff] %v8329_v38 }
 0x10d   : > { %v1625_v5 = vcombine.low %v8247_v61, %v8253_v63  ;;  %v1626_v6 = vcombine.high %v8247_v61, %v8253_v63  ;;  %v1641_v7 = vcombine.low %v8250_v62, %v8256_v0  ;;  %v1642_v8 = vcombine.high %v8250_v62, %v8256_v0  ;;  %9820 = vst [vmem:[#allocation27_spill] sm:$0xff] %v8332_v52 }
 0x10e   : > { %v8273_v11 = vrot.slane %v1849_v3, %v8222_v42  ;;  %v8276_v12 = vrot.slane %v1850_v4, %v8222_v42  ;;  %9821 = vst [vmem:[#allocation28_spill] sm:$0xff] %v8335_v53 }
 0x10f   : > { %v8278_v13 = vpop.trf.xlu1  ;;  %v8280_v14 = vpop.trf.xlu0  ;;  %v8326_v51 = vrot.slane %v1625_v5, %v8317_v44  ;;  %v8348_v62 = vrot.slane %v1626_v6, %v8317_v44  ;;  %v8351_v58 = vrot.slane %v1641_v7, %v8317_v44  ;;  %v8354_v63 = vrot.slane %v1642_v8, %v8317_v44 }
 0x110   : > { %v1897_v15 = vcombine.low %v8267_v9, %v8273_v11  ;;  %v1898_v16 = vcombine.high %v8267_v9, %v8273_v11  ;;  %v1913_v17 = vcombine.low %v8270_v10, %v8276_v12  ;;  %v1914_v18 = vcombine.high %v8270_v10, %v8276_v12  ;;  %v754_v10 = vld [vmem:[%s8185_s23 + $0x1a] sm:$0x3] }
 0x111   : > { %v2122_v21 = vcombine.high %v8280_v14, %v8278_v13  ;;  %v2121_v56 = vcombine.low %v8280_v14, %v8278_v13  ;;  %9822 = vst [vmem:[#allocation29_spill] sm:$0xff] %v8351_v58  ;;  %9823 = vst [vmem:[#allocation30_spill] sm:$0xff] %v8354_v63 }
 0x112   : > { %v8362_v7 = vrot.slane %v1897_v15, %v8317_v44  ;;  %v8365_v8 = vrot.slane %v1898_v16, %v8317_v44  ;;  %v8368_v11 = vrot.slane %v1913_v17, %v8317_v44  ;;  %v8371_v12 = vrot.slane %v1914_v18, %v8317_v44 }
 0x113   : > { %v8298_v23 = vrot.slane %v2122_v21, %v8222_v42  ;;  %4056 = vxpose.xlu1.b32.start.end [1/1] (short) (narrow) %v750_v19, 32  ;;  %v953_v24 = vpop.trf.xlu1  ;;  %4024 = vxpose.xlu0.b32.start.end [1/1] (short) (narrow) %v749_v20, 32  ;;  %v921_v25 = vpop.trf.xlu0 }
 0x115   : > { %v2185_v26 = vcombine.low %v8295_v22, %v8298_v23  ;;  %v2186_v27 = vcombine.high %v8295_v22, %v8298_v23 }
 0x117   : > { %v954_v28 = vpop.trf.xlu1  ;;  %v922_v29 = vpop.trf.xlu0 }
 0x11b   : > { %v8304_v32 = vpop.trf.xlu1  ;;  %v8306_v33 = vpop.trf.xlu0 }
 0x11f   : > { %v8312_v41 = vpop.trf.xlu1  ;;  %v8314_v43 = vpop.trf.xlu0 }
 0x120   : > { %4120 = vxpose.xlu1.b32.start.end [1/1] (short) (narrow) %v752_v35, 32  ;;  %4088 = vxpose.xlu0.b32.start.end [1/1] (short) (narrow) %v751_v36, 32 }
 0x123   : > { %v1017_v46 = vpop.trf.xlu1  ;;  %v985_v47 = vpop.trf.xlu0 }
 0x124   : > { %v1337_v49 = vcombine.low %v953_v24, %v1017_v46  ;;  %v1338_v50 = vcombine.high %v953_v24, %v1017_v46  ;;  %v1321_v39 = vcombine.low %v921_v25, %v985_v47  ;;  %v1322_v40 = vcombine.high %v921_v25, %v985_v47 }
 0x126   : > { %v1345_v54 = vrot.slane %v1337_v49, %v8222_v42  ;;  %v8339_v55 = vrot.slane %v1338_v50, %v8222_v42  ;;  %v1329_v59 = vrot.slane %v1321_v39, %v8222_v42  ;;  %v8343_v60 = vrot.slane %v1322_v40, %v8222_v42 }
 0x127   : > { %v1018_v61 = vpop.trf.xlu1  ;;  %v986_v57 = vpop.trf.xlu0  ;;  %v8400_v50 = vrot.slane %v2186_v27, %v8317_v44 }
 0x128   : > { %v1385_v0 = vcombine.low %v1329_v59, %v1345_v54  ;;  %v1386_v1 = vcombine.high %v1329_v59, %v1345_v54  ;;  %v1401_v2 = vcombine.low %v8343_v60, %v8339_v55  ;;  %v1402_v3 = vcombine.high %v8343_v60, %v8339_v55 }
 0x129   : > { %v1609_v4 = vcombine.low %v954_v28, %v1018_v61  ;;  %v1610_v5 = vcombine.high %v954_v28, %v1018_v61  ;;  %v1593_v9 = vcombine.low %v922_v29, %v986_v57  ;;  %v1594_v6 = vcombine.high %v922_v29, %v986_v57  ;;  %v753_v28 = vld [vmem:[%s8185_s23 + $0x18] sm:$0x3] }
 0x12a   : > { %v8403_v39 = vrot.slane %v1385_v0, %v8317_v44  ;;  %v8406_v40 = vrot.slane %v1386_v1, %v8317_v44 }
 0x12b   : > { %v1617_v19 = vrot.slane %v1609_v4, %v8222_v42  ;;  %v8375_v20 = vrot.slane %v1610_v5, %v8222_v42  ;;  %v1601_v21 = vrot.slane %v1593_v9, %v8222_v42  ;;  %v1608_v24 = vrot.slane %v1594_v6, %v8222_v42  ;;  %v1019_v15 = vpop.trf.xlu1  ;;  %v987_v25 = vpop.trf.xlu0 }
 0x12c   : > { %v1881_v16 = vcombine.low %v8304_v32, %v1019_v15  ;;  %v1882_v17 = vcombine.high %v8304_v32, %v1019_v15  ;;  %v1865_v29 = vcombine.low %v8306_v33, %v987_v25  ;;  %v1866_v18 = vcombine.high %v8306_v33, %v987_v25  ;;  %9824 = vst [vmem:[#allocation31_spill] sm:$0xff] %v8403_v39 }
 0x12d   : > { %v1657_v30 = vcombine.low %v1601_v21, %v1617_v19  ;;  %v1658_v31 = vcombine.high %v1601_v21, %v1617_v19  ;;  %v1673_v34 = vcombine.low %v1608_v24, %v8375_v20  ;;  %v1674_v35 = vcombine.high %v1608_v24, %v8375_v20  ;;  %4184 = vxpose.xlu1.b32.start.end [1/1] (short) (narrow) %v754_v10, 32 }
 0x12e   : > { %v1889_v36 = vrot.slane %v1881_v16, %v8222_v42  ;;  %v1896_v37 = vrot.slane %v1882_v17, %v8222_v42  ;;  %v1873_v46 = vrot.slane %v1865_v29, %v8222_v42  ;;  %v1880_v47 = vrot.slane %v1866_v18, %v8222_v42  ;;  %4152 = vxpose.xlu0.b32.start.end [1/1] (short) (narrow) %v753_v28, 32 }
 0x12f   : > { %v1020_v32 = vpop.trf.xlu1  ;;  %v988_v49 = vpop.trf.xlu0  ;;  %v8394_v33 = vrot.slane %v2185_v26, %v8317_v44  ;;  %9825 = vst [vmem:[#allocation32_spill] sm:$0xff] %v8406_v40  ;;  %v8434_v19 = vrot.slane %v1658_v31, %v8317_v44 }
 0x130   : > { %v1929_v54 = vcombine.low %v1873_v46, %v1889_v36  ;;  %v1930_v59 = vcombine.high %v1873_v46, %v1889_v36  ;;  %v1945_v61 = vcombine.low %v1880_v47, %v1896_v37  ;;  %v1946_v57 = vcombine.high %v1880_v47, %v1896_v37  ;;  %v756_v46 = vld [vmem:[%s8185_s23 + $0x1e] sm:$0x3] }
 0x131   : > { %v2153_v4 = vcombine.low %v8312_v41, %v1020_v32  ;;  %v2154_v26 = vcombine.high %v8312_v41, %v1020_v32  ;;  %v2137_v5 = vcombine.low %v8314_v43, %v988_v49  ;;  %v2138_v22 = vcombine.high %v8314_v43, %v988_v49 }
 0x132   : > { %v8413_v23 = vrot.slane %v1929_v54, %v8317_v44  ;;  %v8416_v27 = vrot.slane %v1930_v59, %v8317_v44  ;;  %v8419_v0 = vrot.slane %v1945_v61, %v8317_v44  ;;  %v8422_v1 = vrot.slane %v1946_v57, %v8317_v44  ;;  %v755_v59 = vld [vmem:[%s8185_s23 + $0x1c] sm:$0x3] }
 0x133   : > { %v2168_v9 = vrot.slane %v2154_v26, %v8222_v42  ;;  %v2152_v41 = vrot.slane %v2138_v22, %v8222_v42  ;;  %v8426_v6 = vpop.trf.xlu1  ;;  %v8428_v10 = vpop.trf.xlu0  ;;  %v8431_v43 = vrot.slane %v1657_v30, %v8317_v44  ;;  %v8445_v25 = vrot.slane %v2153_v4, %v8222_v42 }
 0x134   : > { %9826 = vst [vmem:[#allocation33_spill] sm:$0xff] %v8426_v6  ;;  %9827 = vst [vmem:[#allocation34_spill] sm:$0xff] %v8428_v10  ;;  %v8448_v28 = vrot.slane %v2137_v5, %v8222_v42  ;;  %v8470_v49 = vrot.slane %v1673_v34, %v8317_v44  ;;  %v8473_v54 = vrot.slane %v1674_v35, %v8317_v44 }
 0x135   : > { %v2217_v16 = vcombine.low %v2152_v41, %v2168_v9  ;;  %v2218_v17 = vcombine.high %v2152_v41, %v2168_v9  ;;  %v8488_v34 = vrot.slane %v2121_v56, %v8222_v42  ;;  %v8496_v5 = vrot.slane %v1401_v2, %v8317_v44 }
 0x136   : > { %9828 = vst [vmem:[#allocation35_spill] sm:$0xff] %v8470_v49  ;;  %9829 = vst [vmem:[#allocation36_spill] sm:$0xff] %v8473_v54  ;;  %v2201_v35 = vcombine.low %v8448_v28, %v8445_v25  ;;  %v8502_v22 = vrot.slane %v1402_v3, %v8317_v44 }
 0x137   : > { %v8458_v36 = vpop.trf.xlu1  ;;  %v8460_v37 = vpop.trf.xlu0  ;;  %v8464_v47 = vrot.slane %v2217_v16, %v8317_v44  ;;  %v8467_v32 = vrot.slane %v2218_v17, %v8317_v44  ;;  %9830 = vst [vmem:[#allocation37_spill] sm:$0xff] %v8496_v5 }
 0x138   : > { %9831 = vst [vmem:[#allocation38_spill] sm:$0xff] %v8502_v22  ;;  %v2209_v55 = vrot.slane %v2201_v35, %v8317_v44 }
 0x13a   : > { %4248 = vxpose.xlu1.b32.start.end [1/1] (short) (narrow) %v756_v46, 32  ;;  %v2169_v46 = vcombine.low %v8320_v45, %v8488_v34 }
 0x13b   : > { %4216 = vxpose.xlu0.b32.start.end [1/1] (short) (narrow) %v755_v59, 32  ;;  %v8512_v9 = vpop.trf.xlu1  ;;  %v8514_v41 = vpop.trf.xlu0 }
 0x13c   : > { %v2177_v3 = vrot.slane %v2169_v46, %v8317_v44 }
 0x13e   : > { %v2234_v57 = vcombine.high %v2177_v3, %v2209_v55  ;;  %v2233_v16 = vcombine.low %v2177_v3, %v2209_v55 }
 0x13f   : > { %v8542_v26 = vpop.trf.xlu1  ;;  %v8544_v59 = vpop.trf.xlu0 }
 0x143   : > { %v8547_v4 = vpop.trf.xlu1  ;;  %v8549_v60 = vpop.trf.xlu0 }
 0x144   : > { %9832 = vst [vmem:[#allocation39_spill] sm:$0xff] %v8547_v4  ;;  %9833 = vst [vmem:[#allocation40_spill] sm:$0xff] %v8549_v60 }
 0x147   : > { %v8552_v61 = vpop.trf.xlu1  ;;  %3177 = vxpose.xlu1.b32.start [1/2] (short) (narrow) %v2234_v57, 8  ;;  %v8554_v17 = vpop.trf.xlu0 }
 0x148   : > { %3145 = vxpose.xlu0.b32.start [1/2] (short) (narrow) %v2233_v16, 8 }
 0x14b   : > { %v8556_v31 = vpop.trf.xlu1  ;;  %v8558_v30 = vpop.trf.xlu0 }
 0x14f   : > { %v1148_v18 = vpop.trf.xlu1  ;;  %v1116_v35 = vpop.trf.xlu0 }
 0x150   : > { %v2257_v14 = vcombine.low %v8542_v26, %v1148_v18  ;;  %v2241_v13 = vcombine.low %v8544_v59, %v1116_v35 }
 0x152   : > { %v2265_v5 = vrot.slane %v2257_v14, %v8222_v42  ;;  %v2249_v52 = vrot.slane %v2241_v13, %v8222_v42  ;;  %v2170_v13 = vcombine.high %v8320_v45, %v8488_v34  ;;  %v2242_v45 = vcombine.high %v8544_v59, %v1116_v35 }
 0x153   : > { %v8560_v29 = vpop.trf.xlu1  ;;  %v8562_v15 = vpop.trf.xlu0  ;;  %v9844_v35 = vcombine.high %v8394_v33, %v8464_v47 }
 0x154   : > { %9834 = vst [vmem:[#allocation41_spill] sm:$0xff] %v8560_v29  ;;  %9835 = vst [vmem:[#allocation42_spill] sm:$0xff] %v8562_v15  ;;  %v2305_v54 = vcombine.low %v2249_v52, %v2265_v5  ;;  %v2306_v34 = vcombine.high %v2249_v52, %v2265_v5 }
 0x156   : > { %v2313_v10 = vrot.slane %v2305_v54, %v8317_v44 }
 0x157   : > { %v8564_v24 = vpop.trf.xlu1  ;;  %v8566_v46 = vpop.trf.xlu0 }
 0x15b   : > { %v8568_v55 = vpop.trf.xlu1  ;;  %v8570_v57 = vpop.trf.xlu0 }
 0x15f   : > { %v1212_v3 = vpop.trf.xlu1  ;;  %v1180_v16 = vpop.trf.xlu0 }
 0x163   : > { %v8572_v21 = vpop.trf.xlu1  ;;  %v8574_v20 = vpop.trf.xlu0 }
 0x164   : > { %9836 = vst [vmem:[#allocation43_spill] sm:$0xff] %v8572_v21  ;;  %9837 = vst [vmem:[#allocation44_spill] sm:$0xff] %v8574_v20  ;;  %v2202_v20 = vcombine.high %v8448_v28, %v8445_v25  ;;  %v2184_v25 = vrot.slane %v2170_v13, %v8317_v44  ;;  %v2258_v28 = vcombine.high %v8542_v26, %v1148_v18 }
 0x165   : > { %v2256_v18 = vrot.slane %v2242_v45, %v8222_v42 }
 0x167   : > { %v8576_v2 = vpop.trf.xlu1  ;;  %v8578_v56 = vpop.trf.xlu0 }
 0x16b   : > { %v8582_v22 = vpop.trf.xlu1  ;;  %v8584_v53 = vpop.trf.xlu0 }
 0x16f   : > { %v1276_v40 = vpop.trf.xlu1  ;;  %v1244_v38 = vpop.trf.xlu0 }
 0x170   : > { %v2289_v39 = vcombine.low %v1212_v3, %v1276_v40  ;;  %v2273_v48 = vcombine.low %v1180_v16, %v1244_v38  ;;  %v2274_v60 = vcombine.high %v1180_v16, %v1244_v38 }
 0x172   : > { %v2297_v63 = vrot.slane %v2289_v39, %v8222_v42  ;;  %v2281_v49 = vrot.slane %v2273_v48, %v8222_v42  ;;  %v2290_v48 = vcombine.high %v1212_v3, %v1276_v40  ;;  %v2288_v38 = vrot.slane %v2274_v60, %v8222_v42 }
 0x173   : > { %v8590_v58 = vpop.trf.xlu1  ;;  %v8592_v15 = vpop.trf.xlu0  ;;  %v9845_v3 = vcombine.low %v8394_v33, %v8464_v47  ;;  %v1969_v33 = vcombine.low %v8514_v41, %v8558_v30 }
 0x174   : > { %9838 = vst [vmem:[#allocation45_spill] sm:$0xff] %v8590_v58  ;;  %9839 = vst [vmem:[#allocation46_spill] sm:$0xff] %v8592_v15  ;;  %v2337_v29 = vcombine.low %v2281_v49, %v2297_v63  ;;  %v2216_v58 = vrot.slane %v2202_v20, %v8317_v44  ;;  %v2338_v15 = vcombine.high %v2281_v49, %v2297_v63 }
 0x175   : > { %v2304_v20 = vrot.slane %v2290_v48, %v8222_v42  ;;  %v2320_v49 = vrot.slane %v2306_v34, %v8317_v44  ;;  %v2017_v48 = vcombine.low %v8568_v55, %v8582_v22 }
 0x176   : > { %v2345_v39 = vrot.slane %v2337_v29, %v8317_v44  ;;  %v2236_v40 = vcombine.high %v2184_v25, %v2216_v58  ;;  %v2235_v63 = vcombine.low %v2184_v25, %v2216_v58  ;;  %v2272_v29 = vrot.slane %v2258_v28, %v8222_v42 }
 0x177   : > { %v8598_v14 = vpop.trf.xlu1  ;;  %v8600_v21 = vpop.trf.xlu0  ;;  %v2001_v25 = vcombine.low %v8570_v57, %v8584_v53  ;;  %v2354_v28 = vcombine.high %v2288_v38, %v2304_v20 }
 0x178   : > { %9840 = vst [vmem:[#allocation47_spill] sm:$0xff] %v8598_v14  ;;  %9841 = vst [vmem:[#allocation48_spill] sm:$0xff] %v8600_v21  ;;  %v2370_v6 = vcombine.high %v2313_v10, %v2345_v39  ;;  %v2369_v4 = vcombine.low %v2313_v10, %v2345_v39  ;;  %v2352_v10 = vrot.slane %v2338_v15, %v8317_v44 }
 0x179   : > { %v2321_v59 = vcombine.low %v2256_v18, %v2272_v29  ;;  %v2322_v47 = vcombine.high %v2256_v18, %v2272_v29 }
 0x17a   : > { %3178 = vxpose.xlu1.b32.end [2/2] (short) (narrow) %v2370_v6, 8  ;;  %3146 = vxpose.xlu0.b32.end [2/2] (short) (narrow) %v2369_v4, 8  ;;  %v2353_v4 = vcombine.low %v2288_v38, %v2304_v20  ;;  %v2372_v26 = vcombine.high %v2320_v49, %v2352_v10  ;;  %v2371_v5 = vcombine.low %v2320_v49, %v2352_v10 }
 0x17b   : > { %v8608_v21 = vpop.trf.xlu1  ;;  %v8610_v54 = vpop.trf.xlu0  ;;  %v2329_v39 = vrot.slane %v2321_v59, %v8317_v44  ;;  %v2025_v49 = vrot.slane %v2017_v48, %v8222_v42  ;;  %v2368_v20 = vrot.slane %v2354_v28, %v8317_v44  ;;  %v2336_v59 = vrot.slane %v2322_v47, %v8317_v44 }
 0x17c   : > { %v2361_v60 = vrot.slane %v2353_v4, %v8317_v44  ;;  %v2009_v4 = vrot.slane %v2001_v25, %v8222_v42  ;;  %v2018_v47 = vcombine.high %v8568_v55, %v8582_v22 }
 0x17e   : > { %3241 = vxpose.xlu1.b32.start [1/2] (short) (narrow) %v2236_v40, 8  ;;  %3209 = vxpose.xlu0.b32.start [1/2] (short) (narrow) %v2235_v63, 8  ;;  %v2374_v45 = vcombine.high %v2329_v39, %v2361_v60  ;;  %v2373_v34 = vcombine.low %v2329_v39, %v2361_v60  ;;  %v1985_v40 = vcombine.low %v8512_v9, %v8556_v31 }
 0x17f   : > { %v8617_v52 = vpop.trf.xlu1  ;;  %v8619_v6 = vpop.trf.xlu0  ;;  %v9849_v60 = vcombine.low %v8400_v50, %v8467_v32  ;;  %v2375_v39 = vcombine.low %v2336_v59, %v2368_v20 }
 0x180   : > { %v1993_v38 = vrot.slane %v1985_v40, %v8222_v42 }
 0x182   : > { %3242 = vxpose.xlu1.b32.end [2/2] (short) (narrow) %v2372_v26, 8  ;;  %3210 = vxpose.xlu0.b32.end [2/2] (short) (narrow) %v2371_v5, 8  ;;  %v1977_v26 = vrot.slane %v1969_v33, %v8222_v42  ;;  %v9848_v5 = vcombine.high %v8400_v50, %v8467_v32  ;;  %v9855_v33 = vcombine.low %v8362_v7, %v8413_v23 }
 0x183   : > { %v8622_v58 = vpop.trf.xlu1  ;;  %v8624_v15 = vpop.trf.xlu0 }
 0x184   : > { %9842 = vst [vmem:[#allocation49_spill] sm:$0xff] %v8622_v58  ;;  %9843 = vst [vmem:[#allocation50_spill] sm:$0xff] %v8624_v15  ;;  %v2033_v48 = vcombine.low %v1977_v26, %v1993_v38  ;;  %v9874_v15 = vld [vmem:[#allocation43_spill] sm:$0xff]  ;;  %v9875_v58 = vld [vmem:[#allocation41_spill] sm:$0xff] }
 0x186   : > { %3305 = vxpose.xlu1.b32.start [1/2] (short) (narrow) %v9844_v35, 8  ;;  %3273 = vxpose.xlu0.b32.start [1/2] (short) (narrow) %v9845_v3, 8  ;;  %v2065_v35 = vcombine.low %v2009_v4, %v2025_v49  ;;  %v2376_v3 = vcombine.high %v2336_v59, %v2368_v20  ;;  %v2041_v32 = vrot.slane %v2033_v48, %v8317_v44 }
 0x187   : > { %v8633_v16 = vpop.trf.xlu1  ;;  %v8635_v13 = vpop.trf.xlu0  ;;  %v2002_v20 = vcombine.high %v8570_v57, %v8584_v53 }
 0x188   : > { %9846 = vst [vmem:[#allocation51_spill] sm:$0xff] %v8633_v16  ;;  %9847 = vst [vmem:[#allocation52_spill] sm:$0xff] %v8635_v13 }
 0x189   : > { %v2016_v53 = vrot.slane %v2002_v20, %v8222_v42 }
 0x18a   : > { %3306 = vxpose.xlu1.b32.end [2/2] (short) (narrow) %v2374_v45, 8  ;;  %3274 = vxpose.xlu0.b32.end [2/2] (short) (narrow) %v2373_v34, 8  ;;  %v2073_v45 = vrot.slane %v2065_v35, %v8317_v44  ;;  %v9852_v34 = vcombine.high %v8362_v7, %v8413_v23  ;;  %v1986_v35 = vcombine.high %v8512_v9, %v8556_v31 }
 0x18b   : > { %v8646_v63 = vpop.trf.xlu1  ;;  %v8648_v10 = vpop.trf.xlu0  ;;  %v2032_v23 = vrot.slane %v2018_v47, %v8222_v42  ;;  %v9860_v47 = vcombine.high %v8368_v11, %v8419_v0 }
 0x18c   : > { %v2098_v59 = vcombine.high %v2041_v32, %v2073_v45  ;;  %v2000_v55 = vrot.slane %v1986_v35, %v8222_v42 }
 0x18d   : > { %v2082_v35 = vcombine.high %v2016_v53, %v2032_v23 }
 0x18e   : > { %3369 = vxpose.xlu1.b32.start [1/2] (short) (narrow) %v9848_v5, 8  ;;  %3337 = vxpose.xlu0.b32.start [1/2] (short) (narrow) %v9849_v60, 8  ;;  %v2066_v5 = vcombine.high %v2009_v4, %v2025_v49  ;;  %v2097_v60 = vcombine.low %v2041_v32, %v2073_v45  ;;  %v9857_v49 = vcombine.low %v8365_v8, %v8416_v27 }
 0x18f   : > { %v8658_v29 = vpop.trf.xlu1  ;;  %v8660_v18 = vpop.trf.xlu0  ;;  %v2081_v4 = vcombine.low %v2016_v53, %v2032_v23  ;;  %v2096_v23 = vrot.slane %v2082_v35, %v8317_v44 }
 0x190   : > { %v2080_v22 = vrot.slane %v2066_v5, %v8317_v44  ;;  %v9863_v5 = vcombine.low %v8368_v11, %v8419_v0 }
 0x192   : > { %3370 = vxpose.xlu1.b32.end [2/2] (short) (narrow) %v2376_v3, 8  ;;  %3338 = vxpose.xlu0.b32.end [2/2] (short) (narrow) %v2375_v39, 8  ;;  %v1970_v3 = vcombine.high %v8514_v41, %v8558_v30  ;;  %v2034_v39 = vcombine.high %v1977_v26, %v1993_v38  ;;  %v9856_v30 = vcombine.high %v8365_v8, %v8416_v27 }
 0x193   : > { %v8666_v25 = vpop.trf.xlu1  ;;  %v8668_v28 = vpop.trf.xlu0 }
 0x194   : > { %9850 = vst [vmem:[#allocation53_spill] sm:$0xff] %v8666_v25  ;;  %9851 = vst [vmem:[#allocation54_spill] sm:$0xff] %v8668_v28  ;;  %v1984_v31 = vrot.slane %v1970_v3, %v8222_v42  ;;  %v2048_v57 = vrot.slane %v2034_v39, %v8317_v44  ;;  %v1473_v28 = vcombine.low %v9875_v58, %v9874_v15 }
 0x196   : > { %2921 = vxpose.xlu1.b32.start [1/2] (short) (narrow) %v9852_v34, 8  ;;  %2889 = vxpose.xlu0.b32.start [1/2] (short) (narrow) %v9855_v33, 8  ;;  %v2100_v38 = vcombine.high %v2048_v57, %v2080_v22  ;;  %v2099_v26 = vcombine.low %v2048_v57, %v2080_v22  ;;  %v2049_v45 = vcombine.low %v1984_v31, %v2000_v55 }
 0x197   : > { %v8674_v40 = vpop.trf.xlu1  ;;  %v8676_v50 = vpop.trf.xlu0  ;;  %v2089_v33 = vrot.slane %v2081_v4, %v8317_v44  ;;  %v1713_v22 = vcombine.low %v8458_v36, %v8552_v61  ;;  %v2050_v57 = vcombine.high %v1984_v31, %v2000_v55 }
 0x198   : > { %9853 = vst [vmem:[#allocation55_spill] sm:$0xff] %v8674_v40  ;;  %9854 = vst [vmem:[#allocation56_spill] sm:$0xff] %v8676_v50  ;;  %v2057_v27 = vrot.slane %v2049_v45, %v8317_v44 }
 0x199   : > { %v1721_v53 = vrot.slane %v1713_v22, %v8222_v42  ;;  %v2064_v45 = vrot.slane %v2050_v57, %v8317_v44 }
 0x19a   : > { %2922 = vxpose.xlu1.b32.end [2/2] (short) (narrow) %v2098_v59, 8  ;;  %2890 = vxpose.xlu0.b32.end [2/2] (short) (narrow) %v2097_v60, 8  ;;  %v1745_v59 = vcombine.low %v8564_v24, %v8576_v2  ;;  %v1729_v60 = vcombine.low %v8566_v46, %v8578_v56  ;;  %v2102_v3 = vcombine.high %v2057_v27, %v2089_v33 }
 0x19b   : > { %v8690_v48 = vpop.trf.xlu1  ;;  %v8692_v7 = vpop.trf.xlu0  ;;  %v2101_v39 = vcombine.low %v2057_v27, %v2089_v33  ;;  %v9865_v33 = vcombine.low %v8371_v12, %v8422_v1 }
 0x19c   : > { %v1753_v0 = vrot.slane %v1745_v59, %v8222_v42  ;;  %v1737_v4 = vrot.slane %v1729_v60, %v8222_v42  ;;  %v2104_v59 = vcombine.high %v2064_v45, %v2096_v23  ;;  %v2103_v60 = vcombine.low %v2064_v45, %v2096_v23 }
 0x19d   : > { %v1746_v23 = vcombine.high %v8564_v24, %v8576_v2  ;;  %v9866_v45 = vcombine.high %v8326_v51, %v8431_v43  ;;  %v1714_v24 = vcombine.high %v8458_v36, %v8552_v61  ;;  %v9868_v61 = vcombine.high %v8348_v62, %v8434_v19 }
 0x19e   : > { %2985 = vxpose.xlu1.b32.start [1/2] (short) (narrow) %v9856_v30, 8  ;;  %2953 = vxpose.xlu0.b32.start [1/2] (short) (narrow) %v9857_v49, 8  ;;  %v1697_v30 = vcombine.low %v8460_v37, %v8554_v17  ;;  %v1794_v2 = vcombine.high %v1737_v4, %v1753_v0 }
 0x19f   : > { %v8702_v9 = vpop.trf.xlu1  ;;  %v8704_v41 = vpop.trf.xlu0 }
 0x1a0   : > { %v1808_v36 = vrot.slane %v1794_v2, %v8317_v44 }
 0x1a2   : > { %2986 = vxpose.xlu1.b32.end [2/2] (short) (narrow) %v2100_v38, 8  ;;  %2954 = vxpose.xlu0.b32.end [2/2] (short) (narrow) %v2099_v26, 8  ;;  %v1705_v38 = vrot.slane %v1697_v30, %v8222_v42  ;;  %v9864_v26 = vcombine.high %v8371_v12, %v8422_v1 }
 0x1a3   : > { %v8710_v34 = vpop.trf.xlu1  ;;  %v8712_v32 = vpop.trf.xlu0 }
 0x1a4   : > { %9858 = vst [vmem:[#allocation57_spill] sm:$0xff] %v8710_v34  ;;  %9859 = vst [vmem:[#allocation58_spill] sm:$0xff] %v8712_v32  ;;  %v1761_v35 = vcombine.low %v1705_v38, %v1721_v53 }
 0x1a6   : > { %3049 = vxpose.xlu1.b32.start [1/2] (short) (narrow) %v9860_v47, 8  ;;  %3017 = vxpose.xlu0.b32.start [1/2] (short) (narrow) %v9863_v5, 8  ;;  %v1793_v47 = vcombine.low %v1737_v4, %v1753_v0 }
 0x1a7   : > { %v8718_v20 = vpop.trf.xlu1  ;;  %v8720_v8 = vpop.trf.xlu0 }
 0x1a8   : > { %9861 = vst [vmem:[#allocation59_spill] sm:$0xff] %v8718_v20  ;;  %9862 = vst [vmem:[#allocation60_spill] sm:$0xff] %v8720_v8  ;;  %v1801_v57 = vrot.slane %v1793_v47, %v8317_v44 }
 0x1aa   : > { %3050 = vxpose.xlu1.b32.end [2/2] (short) (narrow) %v2102_v3, 8  ;;  %3018 = vxpose.xlu0.b32.end [2/2] (short) (narrow) %v2101_v39, 8 }
 0x1ab   : > { %v8734_v49 = vpop.trf.xlu1  ;;  %v8736_v11 = vpop.trf.xlu0 }
 0x1ae   : > { %3113 = vxpose.xlu1.b32.start [1/2] (short) (narrow) %v9864_v26, 8  ;;  %3081 = vxpose.xlu0.b32.start [1/2] (short) (narrow) %v9865_v33, 8  ;;  %v1730_v26 = vcombine.high %v8566_v46, %v8578_v56  ;;  %v1698_v56 = vcombine.high %v8460_v37, %v8554_v17 }
 0x1af   : > { %v8746_v55 = vpop.trf.xlu1  ;;  %v8748_v31 = vpop.trf.xlu0 }
 0x1b0   : > { %v5145_v27 = vcombine.high %v8702_v9, %v8746_v55  ;;  %v5129_v5 = vcombine.high %v8704_v41, %v8748_v31  ;;  %v1744_v30 = vrot.slane %v1730_v26, %v8222_v42  ;;  %v9870_v26 = vld [vmem:[#allocation39_spill] sm:$0xff] }
 0x1b2   : > { %v8759_v3 = vrot.slane %v5145_v27, %v8222_v42  ;;  %v8762_v39 = vrot.slane %v5129_v5, %v8222_v42  ;;  %3114 = vxpose.xlu1.b32.end [2/2] (short) (narrow) %v2104_v59, 8  ;;  %3082 = vxpose.xlu0.b32.end [2/2] (short) (narrow) %v2103_v60, 8  ;;  %v1769_v5 = vrot.slane %v1761_v35, %v8317_v44 }
 0x1b3   : > { %v4072_v22 = vpop.trf.xlu1  ;;  %v4040_v12 = vpop.trf.xlu0  ;;  %v9867_v59 = vcombine.low %v8326_v51, %v8431_v43  ;;  %v1762_v60 = vcombine.high %v1705_v38, %v1721_v53  ;;  %v8795_v51 = vrot.slane %v1714_v24, %v8222_v42  ;;  %v8798_v43 = vrot.slane %v1698_v56, %v8222_v42  ;;  %v9872_v24 = vld [vmem:[#allocation40_spill] sm:$0xff]  ;;  %v9873_v56 = vld [vmem:[#allocation34_spill] sm:$0xff] }
 0x1b4   : > { %v1826_v46 = vcombine.high %v1769_v5, %v1801_v57  ;;  %v1825_v47 = vcombine.low %v1769_v5, %v1801_v57  ;;  %v9869_v53 = vcombine.low %v8348_v62, %v8434_v19  ;;  %v9871_v5 = vld [vmem:[#allocation33_spill] sm:$0xff]  ;;  %v1425_v2 = vcombine.low %v9873_v56, %v9872_v24 }
 0x1b5   : > { %v1776_v4 = vrot.slane %v1762_v60, %v8317_v44  ;;  %v1777_v38 = vcombine.low %v8798_v43, %v8795_v51 }
 0x1b6   : > { %2665 = vxpose.xlu1.b32.start [1/2] (short) (narrow) %v9866_v45, 8  ;;  %2633 = vxpose.xlu0.b32.start [1/2] (short) (narrow) %v9867_v59, 8  ;;  %v1760_v45 = vrot.slane %v1746_v23, %v8222_v42  ;;  %v1441_v59 = vcombine.low %v9871_v5, %v9870_v26 }
 0x1b7   : > { %v8776_v33 = vpop.trf.xlu1  ;;  %v8778_v27 = vpop.trf.xlu0  ;;  %v1828_v57 = vcombine.high %v1776_v4, %v1808_v36  ;;  %v1827_v23 = vcombine.low %v1776_v4, %v1808_v36  ;;  %v9876_v36 = vld [vmem:[#allocation44_spill] sm:$0xff]  ;;  %v9877_v4 = vld [vmem:[#allocation42_spill] sm:$0xff]  ;;  %v1785_v34 = vrot.slane %v1777_v38, %v8317_v44  ;;  %v9879_v38 = vld [vmem:[#allocation35_spill] sm:$0xff] }
 0x1b8   : > { %v1809_v37 = vcombine.low %v1744_v30, %v1760_v45  ;;  %v1457_v32 = vcombine.low %v9877_v4, %v9876_v36  ;;  %v1810_v25 = vcombine.high %v1744_v30, %v1760_v45  ;;  %v1778_v30 = vcombine.high %v8798_v43, %v8795_v51  ;;  %v9878_v45 = vld [vmem:[#allocation29_spill] sm:$0xff] }
 0x1b9   : > { %v9881_v51 = vcombine.low %v9878_v45, %v9879_v38 }
 0x1ba   : > { %2666 = vxpose.xlu1.b32.end [2/2] (short) (narrow) %v1826_v46, 8  ;;  %2634 = vxpose.xlu0.b32.end [2/2] (short) (narrow) %v1825_v47, 8  ;;  %v1817_v60 = vrot.slane %v1809_v37, %v8317_v44 }
 0x1bb   : > { %v8790_v35 = vpop.trf.xlu1  ;;  %v8792_v1 = vpop.trf.xlu0 }
 0x1bc   : > { %v1829_v13 = vcombine.low %v1785_v34, %v1817_v60 }
 0x1be   : > { %2729 = vxpose.xlu1.b32.start [1/2] (short) (narrow) %v9868_v61, 8  ;;  %2697 = vxpose.xlu0.b32.start [1/2] (short) (narrow) %v9869_v53, 8 }
 0x1bf   : > { %v8804_v17 = vpop.trf.xlu1  ;;  %v8806_v0 = vpop.trf.xlu0 }
 0x1c2   : > { %2730 = vxpose.xlu1.b32.end [2/2] (short) (narrow) %v1828_v57, 8  ;;  %2698 = vxpose.xlu0.b32.end [2/2] (short) (narrow) %v1827_v23, 8  ;;  %v8840_v23 = vrot.slane %v1425_v2, %v8222_v42  ;;  %v8866_v2 = vrot.slane %v1457_v32, %v8222_v42 }
 0x1c3   : > { %v4136_v46 = vpop.trf.xlu1  ;;  %v4104_v47 = vpop.trf.xlu0 }
 0x1c4   : > { %v4432_v61 = vcombine.low %v4072_v22, %v4136_v46  ;;  %v4433_v62 = vcombine.high %v4072_v22, %v4136_v46  ;;  %v4416_v19 = vcombine.low %v4040_v12, %v4104_v47  ;;  %v4417_v53 = vcombine.high %v4040_v12, %v4104_v47 }
 0x1c5   : > { %v8837_v12 = vrot.slane %v1441_v59, %v8222_v42  ;;  %v9880_v46 = vcombine.high %v9878_v45, %v9879_v38  ;;  %v8863_v59 = vrot.slane %v1473_v28, %v8222_v42 }
 0x1c6   : > { %v8825_v57 = vrot.slane %v4432_v61, %v8222_v42  ;;  %v8828_v50 = vrot.slane %v4433_v62, %v8222_v42  ;;  %v8831_v37 = vrot.slane %v4416_v19, %v8222_v42  ;;  %v8834_v22 = vrot.slane %v4417_v53, %v8222_v42  ;;  %2761 = vxpose.xlu0.b32.start [1/2] (short) (narrow) %v9881_v51, 8 }
 0x1c7   : > { %2793 = vxpose.xlu1.b32.start [1/2] (short) (narrow) %v9880_v46, 8  ;;  %v4137_v47 = vpop.trf.xlu1  ;;  %v4105_v61 = vpop.trf.xlu0  ;;  %v1830_v62 = vcombine.high %v1785_v34, %v1817_v60  ;;  %v1824_v53 = vrot.slane %v1810_v25, %v8317_v44 }
 0x1c8   : > { %v4704_v43 = vcombine.low %v8776_v33, %v4137_v47  ;;  %v4705_v46 = vcombine.high %v8776_v33, %v4137_v47  ;;  %v4688_v8 = vcombine.low %v8778_v27, %v4105_v61  ;;  %v4689_v19 = vcombine.high %v8778_v27, %v4105_v61 }
 0x1ca   : > { %v8870_v45 = vrot.slane %v4704_v43, %v8222_v42  ;;  %v8873_v38 = vrot.slane %v4705_v46, %v8222_v42  ;;  %v8876_v33 = vrot.slane %v4688_v8, %v8222_v42  ;;  %v8879_v27 = vrot.slane %v4689_v19, %v8222_v42  ;;  %2762 = vxpose.xlu0.b32.end [2/2] (short) (narrow) %v1829_v13, 8  ;;  %v9884_v43 = vld [vmem:[#allocation30_spill] sm:$0xff]  ;;  %v9885_v46 = vld [vmem:[#allocation36_spill] sm:$0xff] }
 0x1cb   : > { %2794 = vxpose.xlu1.b32.end [2/2] (short) (narrow) %v1830_v62, 8  ;;  %v4138_v28 = vpop.trf.xlu1  ;;  %v4106_v47 = vpop.trf.xlu0  ;;  %v1521_v8 = vcombine.low %v8866_v2, %v8863_v59  ;;  %v1474_v13 = vcombine.high %v9875_v58, %v9874_v15  ;;  %v1426_v58 = vcombine.high %v9873_v56, %v9872_v24 }
 0x1cc   : > { %v4976_v34 = vcombine.low %v8790_v35, %v4138_v28  ;;  %v4977_v25 = vcombine.high %v8790_v35, %v4138_v28  ;;  %v4960_v32 = vcombine.low %v8792_v1, %v4106_v47  ;;  %v4961_v60 = vcombine.high %v8792_v1, %v4106_v47 }
 0x1cd   : > { %v9886_v28 = vcombine.high %v9884_v43, %v9885_v46 }
 0x1ce   : > { %v8894_v19 = vrot.slane %v4976_v34, %v8222_v42  ;;  %v8897_v35 = vrot.slane %v4977_v25, %v8222_v42  ;;  %v8900_v1 = vrot.slane %v4960_v32, %v8222_v42  ;;  %v8903_v51 = vrot.slane %v4961_v60, %v8222_v42 }
 0x1cf   : > { %2857 = vxpose.xlu1.b32.start [1/2] (short) (narrow) %v9886_v28, 8  ;;  %v8908_v47 = vpop.trf.xlu1  ;;  %v8910_v62 = vpop.trf.xlu0  ;;  %v1792_v34 = vrot.slane %v1778_v30, %v8317_v44  ;;  %v9887_v28 = vcombine.low %v9884_v43, %v9885_v46  ;;  %v1489_v60 = vcombine.low %v8840_v23, %v8837_v12  ;;  %v1458_v43 = vcombine.high %v9877_v4, %v9876_v36 }
 0x1d0   : > { %9882 = vst [vmem:[#allocation39_spill] sm:$0xff] %v8894_v19  ;;  %9883 = vst [vmem:[#allocation33_spill] sm:$0xff] %v8900_v1  ;;  %v5249_v30 = vcombine.high %v8804_v17, %v8908_v47  ;;  %v5233_v25 = vcombine.high %v8806_v0, %v8910_v62  ;;  %v1529_v4 = vrot.slane %v1521_v8, %v8317_v44 }
 0x1d1   : > { %2825 = vxpose.xlu0.b32.start [1/2] (short) (narrow) %v9887_v28, 8  ;;  %v1832_v32 = vcombine.high %v1792_v34, %v1824_v53  ;;  %v1831_v61 = vcombine.low %v1792_v34, %v1824_v53  ;;  %v1442_v53 = vcombine.high %v9871_v5, %v9870_v26  ;;  %v1488_v34 = vrot.slane %v1474_v13, %v8222_v42 }
 0x1d2   : > { %v8937_v46 = vrot.slane %v5249_v30, %v8222_v42  ;;  %v8940_v28 = vrot.slane %v5233_v25, %v8222_v42  ;;  %v1472_v25 = vrot.slane %v1458_v43, %v8222_v42  ;;  %v9889_v30 = vld [vmem:[#allocation31_spill] sm:$0xff]  ;;  %v1497_v24 = vrot.slane %v1489_v60, %v8317_v44 }
 0x1d3   : > { %2858 = vxpose.xlu1.b32.end [2/2] (short) (narrow) %v1832_v32, 8  ;;  %v8942_v14 = vpop.trf.xlu1  ;;  %v8944_v16 = vpop.trf.xlu0  ;;  %v9888_v32 = vld [vmem:[#allocation25_spill] sm:$0xff]  ;;  %v1456_v56 = vrot.slane %v1442_v53, %v8222_v42  ;;  %v1522_v8 = vcombine.high %v8866_v2, %v8863_v59  ;;  %v5112_v2 = vcombine.low %v8617_v52, %v8658_v29  ;;  %v9908_v1 = vcombine.low %v8876_v33, %v8870_v45 }
 0x1d4   : > { %v9890_v40 = vcombine.high %v9888_v32, %v9889_v30  ;;  %v9891_v13 = vcombine.low %v9888_v32, %v9889_v30  ;;  %v1554_v43 = vcombine.high %v1497_v24, %v1529_v4  ;;  %v1553_v36 = vcombine.low %v1497_v24, %v1529_v4 }
 0x1d5   : > { %2826 = vxpose.xlu0.b32.end [2/2] (short) (narrow) %v1831_v61, 8  ;;  %v1440_v61 = vrot.slane %v1426_v58, %v8222_v42  ;;  %v1537_v15 = vcombine.low %v1472_v25, %v1488_v34  ;;  %v1538_v20 = vcombine.high %v1472_v25, %v1488_v34  ;;  %v1536_v59 = vrot.slane %v1522_v8, %v8317_v44  ;;  %v9893_v34 = vld [vmem:[#allocation26_spill] sm:$0xff]  ;;  %v9894_v25 = vld [vmem:[#allocation32_spill] sm:$0xff] }
 0x1d6   : > { %v5096_v32 = vcombine.low %v8619_v6, %v8660_v18  ;;  %v9895_v30 = vcombine.high %v9893_v34, %v9894_v25  ;;  %v5120_v8 = vrot.slane %v5112_v2, %v8222_v42 }
 0x1d7   : > { %2409 = vxpose.xlu1.b32.start [1/2] (short) (narrow) %v9890_v40, 8  ;;  %v8960_v26 = vpop.trf.xlu1  ;;  %v8962_v5 = vpop.trf.xlu0  ;;  %v1490_v40 = vcombine.high %v8840_v23, %v8837_v12  ;;  %v1505_v58 = vcombine.low %v1440_v61, %v1456_v56  ;;  %v1506_v19 = vcombine.high %v1440_v61, %v1456_v56  ;;  %v5144_v12 = vcombine.low %v8702_v9, %v8746_v55 }
 0x1d8   : > { %v5128_v23 = vcombine.low %v8704_v41, %v8748_v31  ;;  %v1545_v56 = vrot.slane %v1537_v15, %v8317_v44  ;;  %v8997_v61 = vrot.slane %v1538_v20, %v8317_v44  ;;  %v9896_v9 = vcombine.low %v9893_v34, %v9894_v25 }
 0x1d9   : > { %2377 = vxpose.xlu0.b32.start [1/2] (short) (narrow) %v9891_v13, 8  ;;  %v1504_v4 = vrot.slane %v1490_v40, %v8317_v44  ;;  %v1513_v55 = vrot.slane %v1505_v58, %v8317_v44  ;;  %v9004_v31 = vrot.slane %v1506_v19, %v8317_v44  ;;  %v5104_v13 = vrot.slane %v5096_v32, %v8222_v42 }
 0x1da   : > { %v5136_v15 = vrot.slane %v5128_v23, %v8222_v42 }
 0x1db   : > { %2410 = vxpose.xlu1.b32.end [2/2] (short) (narrow) %v1554_v43, 8  ;;  %v8974_v60 = vpop.trf.xlu1  ;;  %v8976_v53 = vpop.trf.xlu0  ;;  %v1556_v41 = vcombine.high %v1504_v4, %v1536_v59  ;;  %v5152_v43 = vrot.slane %v5144_v12, %v8222_v42  ;;  %v1555_v20 = vcombine.low %v1504_v4, %v1536_v59  ;;  %v1558_v34 = vcombine.high %v1513_v55, %v1545_v56 }
 0x1dc   : > { %9892 = vst [vmem:[#allocation40_spill] sm:$0xff] %v8976_v53  ;;  %v1557_v25 = vcombine.low %v1513_v55, %v1545_v56  ;;  %v5160_v23 = vcombine.low %v5104_v13, %v5120_v8  ;;  %v5161_v4 = vcombine.high %v5104_v13, %v5120_v8  ;;  %v5248_v8 = vcombine.low %v8804_v17, %v8908_v47 }
 0x1dd   : > { %2378 = vxpose.xlu0.b32.end [2/2] (short) (narrow) %v1553_v36, 8  ;;  %v5232_v13 = vcombine.low %v8806_v0, %v8910_v62 }
 0x1df   : > { %2473 = vxpose.xlu1.b32.start [1/2] (short) (narrow) %v9895_v30, 8  ;;  %v8991_v36 = vpop.trf.xlu1  ;;  %v8993_v24 = vpop.trf.xlu0 }
 0x1e1   : > { %2441 = vxpose.xlu0.b32.start [1/2] (short) (narrow) %v9896_v9, 8  ;;  %v5192_v9 = vcombine.low %v5136_v15, %v5152_v43 }
 0x1e3   : > { %2474 = vxpose.xlu1.b32.end [2/2] (short) (narrow) %v1556_v41, 8  ;;  %v4264_v40 = vpop.trf.xlu1  ;;  %v4232_v30 = vpop.trf.xlu0  ;;  %v5193_v41 = vcombine.high %v5136_v15, %v5152_v43  ;;  %v9897_v43 = vld [vmem:[#allocation27_spill] sm:$0xff]  ;;  %v9898_v15 = vld [vmem:[#allocation37_spill] sm:$0xff] }
 0x1e4   : > { %v4464_v2 = vcombine.low %v8942_v14, %v4264_v40  ;;  %v4465_v32 = vcombine.high %v8942_v14, %v4264_v40  ;;  %v4448_v12 = vcombine.low %v8944_v16, %v4232_v30  ;;  %v4449_v59 = vcombine.high %v8944_v16, %v4232_v30 }
 0x1e5   : > { %2442 = vxpose.xlu0.b32.end [2/2] (short) (narrow) %v1555_v20, 8  ;;  %v5113_v14 = vcombine.high %v8617_v52, %v8658_v29  ;;  %v5097_v16 = vcombine.high %v8619_v6, %v8660_v18  ;;  %v9899_v40 = vcombine.high %v9897_v43, %v9898_v15  ;;  %v9900_v18 = vcombine.low %v9897_v43, %v9898_v15  ;;  %v9902_v29 = vld [vmem:[#allocation28_spill] sm:$0xff]  ;;  %v9903_v6 = vld [vmem:[#allocation38_spill] sm:$0xff] }
 0x1e6   : > { %v9019_v56 = vrot.slane %v4464_v2, %v8222_v42  ;;  %v9022_v55 = vrot.slane %v4465_v32, %v8222_v42  ;;  %v9025_v20 = vrot.slane %v4448_v12, %v8222_v42  ;;  %v9028_v19 = vrot.slane %v4449_v59, %v8222_v42 }
 0x1e7   : > { %2537 = vxpose.xlu1.b32.start [1/2] (short) (narrow) %v9899_v40, 8  ;;  %v4265_v30 = vpop.trf.xlu1  ;;  %v4233_v2 = vpop.trf.xlu0  ;;  %v9057_v12 = vrot.slane %v5160_v23, %v8317_v44  ;;  %v9060_v59 = vrot.slane %v5192_v9, %v8317_v44  ;;  %v9063_v40 = vrot.slane %v5161_v4, %v8317_v44  ;;  %v9066_v43 = vrot.slane %v5193_v41, %v8317_v44 }
 0x1e8   : > { %v4736_v17 = vcombine.low %v8960_v26, %v4265_v30  ;;  %v4737_v0 = vcombine.high %v8960_v26, %v4265_v30  ;;  %v4720_v62 = vcombine.low %v8962_v5, %v4233_v2  ;;  %v4721_v47 = vcombine.high %v8962_v5, %v4233_v2 }
 0x1e9   : > { %2505 = vxpose.xlu0.b32.start [1/2] (short) (narrow) %v9900_v18, 8  ;;  %v9077_v9 = vrot.slane %v5248_v8, %v8222_v42  ;;  %v9080_v4 = vrot.slane %v5232_v13, %v8222_v42  ;;  %v9090_v8 = vrot.slane %v5097_v16, %v8222_v42  ;;  %v9904_v52 = vcombine.high %v9902_v29, %v9903_v6 }
 0x1ea   : > { %v4744_v15 = vrot.slane %v4736_v17, %v8222_v42  ;;  %v4751_v26 = vrot.slane %v4737_v0, %v8222_v42  ;;  %v4728_v30 = vrot.slane %v4720_v62, %v8222_v42  ;;  %v4735_v5 = vrot.slane %v4721_v47, %v8222_v42 }
 0x1eb   : > { %2538 = vxpose.xlu1.b32.end [2/2] (short) (narrow) %v1558_v34, 8  ;;  %v9072_v23 = vpop.trf.xlu1  ;;  %v9074_v2 = vpop.trf.xlu0  ;;  %v9087_v47 = vrot.slane %v5113_v14, %v8222_v42  ;;  %v5224_v14 = vcombine.low %v9057_v12, %v9060_v59 }
 0x1ec   : > { %9901 = vst [vmem:[#allocation34_spill] sm:$0xff] %v9074_v2  ;;  %v5009_v41 = vcombine.high %v8974_v60, %v9072_v23  ;;  %v4993_v18 = vcombine.high %v8976_v53, %v9074_v2  ;;  %v4784_v17 = vcombine.low %v4728_v30, %v4744_v15  ;;  %v4785_v0 = vcombine.high %v4728_v30, %v4744_v15 }
 0x1ed   : > { %2506 = vxpose.xlu0.b32.end [2/2] (short) (narrow) %v1557_v25, 8  ;;  %v4800_v34 = vcombine.low %v4735_v5, %v4751_v26  ;;  %v4801_v62 = vcombine.high %v4735_v5, %v4751_v26  ;;  %v5225_v15 = vcombine.high %v9057_v12, %v9060_v59  ;;  %v9905_v26 = vcombine.low %v8831_v37, %v8825_v57 }
 0x1ee   : > { %v5023_v13 = vrot.slane %v5009_v41, %v8222_v42  ;;  %v5007_v25 = vrot.slane %v4993_v18, %v8222_v42  ;;  %v9906_v18 = vcombine.low %v9902_v29, %v9903_v6  ;;  %v9907_v12 = vcombine.high %v8831_v37, %v8825_v57 }
 0x1ef   : > { %2601 = vxpose.xlu1.b32.start [1/2] (short) (narrow) %v9904_v52, 8  ;;  %v4267_v32 = vpop.trf.xlu1  ;;  %v9097_v58 = vpop.trf.xlu0  ;;  %v9109_v30 = vrot.slane %v9905_v26, %v8317_v44  ;;  %v5296_v52 = vcombine.low %v9080_v4, %v9077_v9  ;;  %v9909_v6 = vcombine.low %v8834_v22, %v8828_v50  ;;  %v9186_v2 = vrot.slane %v4785_v0, %v8317_v44 }
 0x1f0   : > { %v5072_v5 = vcombine.low %v5007_v25, %v5023_v13  ;;  %v5073_v41 = vcombine.high %v5007_v25, %v5023_v13  ;;  %v9120_v59 = vrot.slane %v9907_v12, %v8317_v44  ;;  %v5280_v16 = vcombine.low %v8991_v36, %v4267_v32 }
 0x1f1   : > { %2569 = vxpose.xlu0.b32.start [1/2] (short) (narrow) %v9906_v18, 8  ;;  %v5264_v26 = vcombine.low %v8993_v24, %v9097_v58  ;;  %v9129_v13 = vrot.slane %v9908_v1, %v8317_v44  ;;  %v9135_v29 = vrot.slane %v9909_v6, %v8317_v44  ;;  %v9910_v25 = vcombine.high %v8876_v33, %v8870_v45 }
 0x1f2   : > { %v9138_v57 = vrot.slane %v5072_v5, %v8317_v44  ;;  %v9141_v37 = vrot.slane %v5073_v41, %v8317_v44  ;;  %v9911_v1 = vcombine.low %v8879_v27, %v8873_v38  ;;  %v5288_v6 = vrot.slane %v5280_v16, %v8222_v42 }
 0x1f3   : > { %v9147_v18 = vrot.slane %v9910_v25, %v8317_v44  ;;  %v5272_v5 = vrot.slane %v5264_v26, %v8222_v42  ;;  %v9912_v41 = vcombine.high %v9004_v31, %v8997_v61  ;;  %v9913_v45 = vcombine.low %v8903_v51, %v8897_v35 }
 0x1f4   : > { %v9153_v12 = vrot.slane %v9911_v1, %v8317_v44  ;;  %v9914_v25 = vcombine.high %v8879_v27, %v8873_v38  ;;  %v9915_v16 = vcombine.low %v9004_v31, %v8997_v61  ;;  %v5304_v26 = vrot.slane %v5296_v52, %v8317_v44 }
 0x1f5   : > { %2602 = vxpose.xlu1.b32.end [2/2] (short) (narrow) %v9912_v41, 8  ;;  %v9164_v33 = vrot.slane %v9913_v45, %v8317_v44  ;;  %v9916_v41 = vcombine.high %v8903_v51, %v8897_v35  ;;  %v9183_v45 = vrot.slane %v4784_v17, %v8317_v44  ;;  %v5281_v38 = vcombine.high %v8991_v36, %v4267_v32  ;;  %v3193_v32 = vpop.trf.xlu1 }
 0x1f6   : > { %v9170_v1 = vrot.slane %v9914_v25, %v8317_v44  ;;  %2570 = vxpose.xlu0.b32.end [2/2] (short) (narrow) %v9915_v16, 8  ;;  %v5328_v27 = vcombine.low %v5272_v5, %v5288_v6  ;;  %v9917_v61 = vcombine.low %v9025_v20, %v9019_v56  ;;  %v9918_v35 = vcombine.high %v9025_v20, %v9019_v56 }
 0x1f7   : > { %v9180_v53 = vrot.slane %v9916_v41, %v8317_v44  ;;  %v9211_v25 = vrot.slane %v4800_v34, %v8317_v44  ;;  %v9214_v56 = vrot.slane %v4801_v62, %v8317_v44  ;;  %v9919_v20 = vcombine.low %v9028_v19, %v9022_v55 }
 0x1f8   : > { %v9193_v31 = vrot.slane %v9917_v61, %v8317_v44  ;;  %v9199_v51 = vrot.slane %v9918_v35, %v8317_v44  ;;  %v5336_v52 = vrot.slane %v5328_v27, %v8317_v44  ;;  %v5265_v27 = vcombine.high %v8993_v24, %v9097_v58 }
 0x1f9   : > { %6168 = vxpose.xlu1.b32.start [1/2] (short) (narrow) %v5225_v15, 8  ;;  %v9220_v16 = vrot.slane %v9919_v20, %v8317_v44  ;;  %v5329_v61 = vcombine.high %v5272_v5, %v5288_v6  ;;  %v9235_v41 = vrot.slane %v5281_v38, %v8222_v42  ;;  %v3161_v15 = vpop.trf.xlu0  ;;  %v9920_v34 = vcombine.high %v8834_v22, %v8828_v50 }
 0x1fa   : > { %6136 = vxpose.xlu0.b32.start [1/2] (short) (narrow) %v5224_v14, 8  ;;  %v5361_v35 = vcombine.high %v5304_v26, %v5336_v52  ;;  %v5360_v20 = vcombine.low %v5304_v26, %v5336_v52  ;;  %v5297_v14 = vcombine.high %v9080_v4, %v9077_v9  ;;  %v9921_v24 = vcombine.high %v9028_v19, %v9022_v55  ;;  %v3257_v5 = vpop.trf.xlu1 }
 0x1fb   : > { %v9241_v36 = vrot.slane %v9920_v34, %v8317_v44  ;;  %v5279_v26 = vrot.slane %v5265_v27, %v8222_v42  ;;  %v5343_v38 = vrot.slane %v5329_v61, %v8317_v44  ;;  %v5176_v27 = vcombine.low %v9090_v8, %v9087_v47 }
 0x1fc   : > { %v9247_v58 = vrot.slane %v9921_v24, %v8317_v44  ;;  %v9922_v61 = vcombine.high %v9063_v40, %v9066_v43  ;;  %v5311_v52 = vrot.slane %v5297_v14, %v8317_v44  ;;  %v4872_v50 = vcombine.low %v8690_v48, %v8734_v49 }
 0x1fd   : > { %6169 = vxpose.xlu1.b32.end [2/2] (short) (narrow) %v5361_v35, 8  ;;  %v5226_v35 = vcombine.low %v9063_v40, %v9066_v43  ;;  %v3225_v34 = vpop.trf.xlu0  ;;  %v5344_v55 = vcombine.low %v5279_v26, %v9235_v41  ;;  %v5184_v40 = vrot.slane %v5176_v27, %v8317_v44  ;;  %v4856_v43 = vcombine.low %v8692_v7, %v8736_v11 }
 0x1fe   : > { %6137 = vxpose.xlu0.b32.end [2/2] (short) (narrow) %v5360_v20, 8  ;;  %v5363_v19 = vcombine.high %v5311_v52, %v5343_v38  ;;  %v9923_v20 = vcombine.low %v8762_v39, %v8759_v3  ;;  %v5362_v22 = vcombine.low %v5311_v52, %v5343_v38  ;;  %v3551_v6 = vcombine.low %v3161_v15, %v3225_v34 }
 0x1ff   : > { %v4824_v27 = vcombine.low %v8610_v54, %v8648_v10  ;;  %v9301_v9 = vrot.slane %v4872_v50, %v8222_v42  ;;  %v9927_v50 = vcombine.high %v8762_v39, %v8759_v3 }
 0x200   : > { %v5216_v24 = vrot.slane %v9923_v20, %v8317_v44  ;;  %v5177_v20 = vcombine.high %v9090_v8, %v9087_v47  ;;  %v5008_v47 = vcombine.low %v8974_v60, %v9072_v23  ;;  %v9925_v8 = vld [vmem:[#allocation34_spill] sm:$0xff] }
 0x201   : > { %6232 = vxpose.xlu1.b32.start [1/2] (short) (narrow) %v9922_v61, 8  ;;  %v3559_v61 = vcombine.low %v3193_v32, %v3257_v5  ;;  %v9924_v32 = vcombine.low %v8940_v28, %v8937_v46  ;;  %v5223_v34 = vrot.slane %v9927_v50, %v8317_v44  ;;  %v4832_v23 = vrot.slane %v4824_v27, %v8222_v42 }
 0x202   : > { %6200 = vxpose.xlu0.b32.start [1/2] (short) (narrow) %v5226_v35, 8  ;;  %v5229_v14 = vcombine.high %v5184_v40, %v5216_v24  ;;  %v5352_v35 = vrot.slane %v5344_v55, %v8317_v44  ;;  %v3321_v4 = vpop.trf.xlu1  ;;  %v5228_v38 = vcombine.low %v5184_v40, %v5216_v24  ;;  %v3289_v52 = vpop.trf.xlu0  ;;  %v9926_v55 = vld [vmem:[#allocation40_spill] sm:$0xff]  ;;  %v5345_v24 = vcombine.high %v5279_v26, %v9235_v41 }
 0x203   : > { %v5320_v15 = vrot.slane %v9924_v32, %v8317_v44  ;;  %v4992_v5 = vcombine.low %v9926_v55, %v9925_v8  ;;  %v5191_v62 = vrot.slane %v5177_v20, %v8317_v44  ;;  %v5016_v39 = vrot.slane %v5008_v47, %v8222_v42 }
 0x204   : > { %v9928_v55 = vcombine.high %v8940_v28, %v8937_v46  ;;  %v4873_v46 = vcombine.high %v8690_v48, %v8734_v49  ;;  %v4857_v28 = vcombine.high %v8692_v7, %v8736_v11  ;;  %v9929_v7 = vld [vmem:[#allocation33_spill] sm:$0xff]  ;;  %v9930_v49 = vld [vmem:[#allocation39_spill] sm:$0xff] }
 0x205   : > { %6233 = vxpose.xlu1.b32.end [2/2] (short) (narrow) %v5363_v19, 8  ;;  %v4840_v19 = vcombine.low %v8608_v21, %v8646_v63  ;;  %v5365_v40 = vcombine.high %v5320_v15, %v5352_v35  ;;  %v5364_v32 = vcombine.low %v5320_v15, %v5352_v35  ;;  %v5231_v41 = vcombine.high %v5191_v62, %v5223_v34 }
 0x206   : > { %6201 = vxpose.xlu0.b32.end [2/2] (short) (narrow) %v5362_v22, 8  ;;  %v9308_v22 = vrot.slane %v4856_v43, %v8222_v42  ;;  %v3558_v43 = vrot.slane %v3551_v6, %v8222_v42  ;;  %v5000_v6 = vrot.slane %v4992_v5, %v8222_v42  ;;  %v5359_v35 = vrot.slane %v5345_v24, %v8317_v44 }
 0x207   : > { %v4848_v60 = vrot.slane %v4840_v19, %v8222_v42  ;;  %v5230_v19 = vcombine.low %v5191_v62, %v5223_v34  ;;  %v5327_v47 = vrot.slane %v9928_v55, %v8317_v44  ;;  %v9931_v11 = vcombine.low %v9929_v7, %v9930_v49 }
 0x208   : > { %v4920_v3 = vcombine.low %v9308_v22, %v9301_v9  ;;  %v5056_v5 = vcombine.low %v5000_v6, %v5016_v39 }
 0x209   : > { %6296 = vxpose.xlu1.b32.start [1/2] (short) (narrow) %v5229_v14, 8  ;;  %v3566_v14 = vrot.slane %v3559_v61, %v8222_v42  ;;  %v4888_v8 = vcombine.low %v4832_v23, %v4848_v60  ;;  %v5366_v62 = vcombine.low %v5327_v47, %v5359_v35  ;;  %v4889_v48 = vcombine.high %v4832_v23, %v4848_v60 }
 0x20a   : > { %6264 = vxpose.xlu0.b32.start [1/2] (short) (narrow) %v5228_v38, 8  ;;  %v3385_v38 = vpop.trf.xlu1  ;;  %v3353_v61 = vpop.trf.xlu0 }
 0x20b   : > { %v3575_v26 = vcombine.low %v3321_v4, %v3385_v38  ;;  %v3583_v20 = vcombine.low %v3558_v43, %v3566_v14  ;;  %v3567_v15 = vcombine.low %v3289_v52, %v3353_v61  ;;  %v4928_v4 = vrot.slane %v4920_v3, %v8317_v44 }
 0x20c   : > { %v4896_v34 = vrot.slane %v4888_v8, %v8317_v44  ;;  %v4921_v43 = vcombine.high %v9308_v22, %v9301_v9  ;;  %v5064_v38 = vrot.slane %v5056_v5, %v8317_v44  ;;  %v5032_v9 = vrot.slane %v9931_v11, %v8317_v44  ;;  %v9940_v11 = vld [vmem:[#allocation56_spill] sm:$0xff] }
 0x20d   : > { %6297 = vxpose.xlu1.b32.end [2/2] (short) (narrow) %v5365_v40, 8  ;;  %v3582_v27 = vrot.slane %v3575_v26, %v8222_v42  ;;  %v3574_v50 = vrot.slane %v3567_v15, %v8222_v42  ;;  %v5367_v40 = vcombine.high %v5327_v47, %v5359_v35  ;;  %v3590_v52 = vrot.slane %v3583_v20, %v8317_v44 }
 0x20e   : > { %6265 = vxpose.xlu0.b32.end [2/2] (short) (narrow) %v5364_v32, 8  ;;  %v4953_v32 = vcombine.high %v4896_v34, %v4928_v4  ;;  %v4841_v26 = vcombine.high %v8608_v21, %v8646_v63  ;;  %v4952_v61 = vcombine.low %v4896_v34, %v4928_v4  ;;  %v4825_v35 = vcombine.high %v8610_v54, %v8648_v10 }
 0x20f   : > { %v3591_v24 = vcombine.low %v3574_v50, %v3582_v27  ;;  %v4887_v22 = vrot.slane %v4873_v46, %v8222_v42  ;;  %v4871_v20 = vrot.slane %v4857_v28, %v8222_v42  ;;  %v5057_v15 = vcombine.high %v5000_v6, %v5016_v39  ;;  %v7687_v46 = vld.sshfl [vmem:[%s8167_s28] sm:$0xf pattern:$0x76325410] }
 0x210   : > { %v5089_v21 = vcombine.high %v5032_v9, %v5064_v38  ;;  %v4935_v63 = vrot.slane %v4921_v43, %v8317_v44  ;;  %v5088_v54 = vcombine.low %v5032_v9, %v5064_v38  ;;  %v4855_v60 = vrot.slane %v4841_v26, %v8222_v42  ;;  %v7688_v28 = vld.sshfl [vmem:[%s8167_s28 + $0x2] sm:$0xf pattern:$0x76325410]  ;;  %v9935_v43 = vld [vmem:[#allocation51_spill] sm:$0xff] }
 0x211   : > { %6360 = vxpose.xlu1.b32.start [1/2] (short) (narrow) %v5231_v41, 8  ;;  %v3598_v14 = vrot.slane %v3591_v24, %v8317_v44  ;;  %v4839_v23 = vrot.slane %v4825_v35, %v8222_v42  ;;  %v4903_v27 = vrot.slane %v4889_v48, %v8317_v44  ;;  %v4936_v8 = vcombine.low %v4871_v20, %v4887_v22  ;;  %v9934_v24 = vld [vmem:[#allocation55_spill] sm:$0xff]  ;;  %v7689_v48 = vld.sshfl [vmem:[%s8167_s28 + $0x8] sm:$0xf pattern:$0x76325410] }
 0x212   : > { %6328 = vxpose.xlu0.b32.start [1/2] (short) (narrow) %v5230_v19, 8  ;;  %v2937_v19 = vpop.trf.xlu1  ;;  %v2905_v10 = vpop.trf.xlu0  ;;  %v5071_v6 = vrot.slane %v5057_v15, %v8317_v44  ;;  %v9932_v50 = vcombine.high %v9929_v7, %v9930_v49  ;;  %v7690_v7 = vld.sshfl [vmem:[%s8167_s28 + $0xa] sm:$0xf pattern:$0x76325410]  ;;  %v9939_v49 = vld [vmem:[#allocation60_spill] sm:$0xff] }
 0x213   : > { %v3599_v3 = vcombine.low %v3590_v52, %v3598_v14  ;;  %v3600_v41 = vcombine.high %v3590_v52, %v3598_v14  ;;  %v4955_v39 = vcombine.high %v4903_v27, %v4935_v63  ;;  %v4954_v55 = vcombine.low %v4903_v27, %v4935_v63  ;;  %v7692_v27 = vld.sshfl [vmem:[%s8167_s28 + $0x12] sm:$0xf pattern:$0x76325410] }
 0x214   : > { %v4904_v47 = vcombine.low %v4839_v23, %v4855_v60  ;;  %v5039_v4 = vrot.slane %v9932_v50, %v8317_v44  ;;  %v4944_v14 = vrot.slane %v4936_v8, %v8317_v44  ;;  %v4584_v9 = vcombine.low %v9940_v11, %v9939_v49  ;;  %v7694_v50 = vld.sshfl [vmem:[%s8167_s28 + $0x1a] sm:$0xf pattern:$0x76325410] }
 0x215   : > { %6361 = vxpose.xlu1.b32.end [2/2] (short) (narrow) %v5367_v40, 8  ;;  %7500 = vmatprep.subr.mxu0 %v3599_v3  ;;  %v9933_v40 = vld [vmem:[#allocation59_spill] sm:$0xff]  ;;  %v4937_v63 = vcombine.high %v4871_v20, %v4887_v22  ;;  %v533_v17 = vcombine.low %v7689_v48, %v7690_v7 }
 0x216   : > { %6329 = vxpose.xlu0.b32.end [2/2] (short) (narrow) %v5366_v62, 8  ;;  %7511 = vmatprep.subr.mxu1 %v3600_v41  ;;  %v4600_v52 = vcombine.low %v9934_v24, %v9933_v40  ;;  %v5091_v34 = vcombine.high %v5039_v4, %v5071_v6  ;;  %v5090_v35 = vcombine.low %v5039_v4, %v5071_v6 }
 0x217   : > { %7501 = vmatpush3.msra.mxu0 %v3599_v3  ;;  %7512 = vmatpush3.msra.mxu1 %v3600_v41  ;;  %v9937_v3 = vld [vmem:[#allocation52_spill] sm:$0xff]  ;;  %v4912_v15 = vrot.slane %v4904_v47, %v8317_v44  ;;  %v525_v6 = vcombine.low %v7687_v46, %v7688_v28  ;;  %v4951_v22 = vrot.slane %v4937_v63, %v8317_v44 }
 0x218   : > { %v9938_v41 = vld [vmem:[#allocation48_spill] sm:$0xff]  ;;  %v540_v20 = vrot.slane %v533_v17, %v8317_v44 }
 0x219   : > { %5912 = vxpose.xlu1.b32.start [1/2] (short) (narrow) %v4953_v32, 8  ;;  %v9936_v32 = vld [vmem:[#allocation47_spill] sm:$0xff]  ;;  %v4552_v26 = vcombine.low %v9938_v41, %v9937_v3  ;;  %v4957_v8 = vcombine.high %v4912_v15, %v4944_v14  ;;  %v4956_v4 = vcombine.low %v4912_v15, %v4944_v14  ;;  %v532_v47 = vrot.slane %v525_v6, %v8317_v44 }
 0x21a   : > { %5880 = vxpose.xlu0.b32.start [1/2] (short) (narrow) %v4952_v61, 8  ;;  %v3001_v5 = vpop.trf.xlu1  ;;  %v2969_v62 = vpop.trf.xlu0  ;;  %v4568_v38 = vcombine.low %v9936_v32, %v9935_v43  ;;  %v4905_v61 = vcombine.high %v4839_v23, %v4855_v60 }
 0x21b   : > { %v3509_v60 = vcombine.low %v2937_v19, %v3001_v5  ;;  %v3501_v23 = vcombine.low %v2905_v10, %v2969_v62  ;;  %v541_v46 = vcombine.low %v532_v47, %v540_v20  ;;  %v542_v28 = vcombine.high %v532_v47, %v540_v20 }
 0x21c   : > { %v9393_v10 = vrot.slane %v4568_v38, %v8222_v42  ;;  %v4919_v14 = vrot.slane %v4905_v61, %v8317_v44  ;;  %v9400_v48 = vrot.slane %v4552_v26, %v8222_v42  ;;  %v9941_v38 = vcombine.high %v9164_v33, %v9138_v57 }
 0x21d   : > { %5913 = vxpose.xlu1.b32.end [2/2] (short) (narrow) %v5089_v21, 8  ;;  %v9380_v21 = vrot.slane %v4600_v52, %v8222_v42  ;;  %v3516_v5 = vrot.slane %v3509_v60, %v8222_v42  ;;  %v3508_v52 = vrot.slane %v3501_v23, %v8222_v42  ;;  %v9942_v61 = vcombine.low %v9164_v33, %v9138_v57 }
 0x21e   : > { %5881 = vxpose.xlu0.b32.end [2/2] (short) (narrow) %v5088_v54, 8  ;;  %v7691_v54 = vld.sshfl [vmem:[%s8167_s28 + $0x10] sm:$0xf pattern:$0x76325410]  ;;  %v4959_v15 = vcombine.high %v4919_v14, %v4951_v22  ;;  %v4616_v57 = vcombine.low %v9400_v48, %v9393_v10  ;;  %v9943_v20 = vcombine.high %v9180_v53, %v9141_v37 }
 0x21f   : > { %v575_v19 = vcombine.low %v7691_v54, %v7692_v27  ;;  %v593_v26 = vmul.f32 0.17677669, %v541_v46  ;;  %v595_v27 = vmul.f32 0.17677669, %v542_v28 }
 0x221   : > { %5976 = vxpose.xlu1.b32.start [1/2] (short) (narrow) %v4955_v39, 8  ;;  %597 = vst.msk [vmem:[#allocation3] sm:$0xff] %vm472_vm0, %v593_v26  ;;  %599 = vst.msk [vmem:[#allocation3 + $0x10] sm:$0xff] %vm472_vm0, %v595_v27 }
 0x222   : > { %5944 = vxpose.xlu0.b32.start [1/2] (short) (narrow) %v4954_v55, 8  ;;  %v3065_v39 = vpop.trf.xlu1  ;;  %v7693_v55 = vld.sshfl [vmem:[%s8167_s28 + $0x18] sm:$0xf pattern:$0x76325410]  ;;  %v3033_v0 = vpop.trf.xlu0 }
 0x223   : > { %v583_v62 = vcombine.low %v7693_v55, %v7694_v50  ;;  %v4958_v55 = vcombine.low %v4919_v14, %v4951_v22  ;;  %v9944_v14 = vcombine.low %v9180_v53, %v9141_v37  ;;  %v4553_v53 = vcombine.high %v9938_v41, %v9937_v3 }
 0x224   : > { %v4617_v37 = vcombine.high %v9400_v48, %v9393_v10  ;;  %v9945_v41 = vcombine.high %v9129_v13, %v9183_v45  ;;  %v9946_v10 = vcombine.low %v9129_v13, %v9183_v45  ;;  %v9950_v45 = vld [vmem:[#allocation58_spill] sm:$0xff] }
 0x225   : > { %5977 = vxpose.xlu1.b32.end [2/2] (short) (narrow) %v5091_v34, 8  ;;  %v9387_v34 = vrot.slane %v4584_v9, %v8222_v42  ;;  %v590_v9 = vrot.slane %v583_v62, %v8317_v44  ;;  %v4585_v62 = vcombine.high %v9940_v11, %v9939_v49  ;;  %v4567_v3 = vrot.slane %v4553_v53, %v8222_v42 }
 0x226   : > { %5945 = vxpose.xlu0.b32.end [2/2] (short) (narrow) %v5090_v35, 8  ;;  %v582_v35 = vrot.slane %v575_v19, %v8317_v44  ;;  %v4624_v19 = vrot.slane %v4616_v57, %v8317_v44  ;;  %v9952_v57 = vcombine.low %v9147_v18, %v9186_v2 }
 0x227   : > { %v4648_v17 = vcombine.low %v9387_v34, %v9380_v21  ;;  %v4649_v46 = vcombine.high %v9387_v34, %v9380_v21  ;;  %v4599_v49 = vrot.slane %v4585_v62, %v8222_v42  ;;  %v4631_v34 = vrot.slane %v4617_v37, %v8317_v44  ;;  %v9955_v62 = vld [vmem:[#allocation50_spill] sm:$0xff] }
 0x228   : > { %v591_v23 = vcombine.low %v582_v35, %v590_v9  ;;  %v592_v6 = vcombine.high %v582_v35, %v590_v9 }
 0x229   : > { %6040 = vxpose.xlu1.b32.start [1/2] (short) (narrow) %v4957_v8, 8  ;;  %v3533_v8 = vcombine.low %v3508_v52, %v3516_v5  ;;  %v4601_v52 = vcombine.high %v9934_v24, %v9933_v40  ;;  %v4569_v40 = vcombine.high %v9936_v32, %v9935_v43  ;;  %v4663_v11 = vrot.slane %v4649_v46, %v8317_v44 }
 0x22a   : > { %6008 = vxpose.xlu0.b32.start [1/2] (short) (narrow) %v4956_v4, 8  ;;  %v3129_v7 = vpop.trf.xlu1  ;;  %v3097_v54 = vpop.trf.xlu0  ;;  %v596_v4 = vmul.f32 0.17677669, %v592_v6  ;;  %v9949_v6 = vld [vmem:[#allocation53_spill] sm:$0xff] }
 0x22b   : > { %v3525_v63 = vcombine.low %v3065_v39, %v3129_v7  ;;  %v3517_v60 = vcombine.low %v3033_v0, %v3097_v54  ;;  %v594_v39 = vmul.f32 0.17677669, %v591_v23  ;;  %v4656_v0 = vrot.slane %v4648_v17, %v8317_v44  ;;  %v775_v7 = vld [vmem:[#allocation3 + $0x10] sm:$0xff]  ;;  %v9948_v23 = vld [vmem:[#allocation57_spill] sm:$0xff] }
 0x22c   : > { %v3540_v22 = vrot.slane %v3533_v8, %v8317_v44  ;;  %600 = vst.msk [vmem:[#allocation3 + $0x18] sm:$0xff] %vm472_vm0, %v596_v4  ;;  %7519 = vmatprep.mubr.msk.f32.mxu1 %vm472_vm0, %v775_v7  ;;  %v4615_v24 = vrot.slane %v4601_v52, %v8222_v42  ;;  %v4583_v32 = vrot.slane %v4569_v40, %v8222_v42 }
 0x22d   : > { %6041 = vxpose.xlu1.b32.end [2/2] (short) (narrow) %v9941_v38, 8  ;;  %v3532_v50 = vrot.slane %v3525_v63, %v8222_v42  ;;  %v3524_v33 = vrot.slane %v3517_v60, %v8222_v42  ;;  %598 = vst.msk [vmem:[#allocation3 + $0x8] sm:$0xff] %vm472_vm0, %v594_v39  ;;  %v4681_v28 = vcombine.high %v4624_v19, %v4656_v0  ;;  %v773_v38 = vld [vmem:[#allocation3] sm:$0xff] }
 0x22e   : > { %6009 = vxpose.xlu0.b32.end [2/2] (short) (narrow) %v9942_v61, 8  ;;  %v4680_v9 = vcombine.low %v4624_v19, %v4656_v0  ;;  %7508 = vmatprep.mubr.msk.f32.mxu0 %vm472_vm0, %v773_v38  ;;  %v4664_v48 = vcombine.low %v4599_v49, %v4615_v24  ;;  %v4683_v61 = vcombine.high %v4631_v34, %v4663_v11  ;;  %v9953_v19 = vld [vmem:[#allocation49_spill] sm:$0xff] }
 0x22f   : > { %v3541_v47 = vcombine.low %v3524_v33, %v3532_v50  ;;  %v4632_v63 = vcombine.low %v4567_v3, %v4583_v32  ;;  %v9947_v8 = vcombine.high %v9147_v18, %v9186_v2  ;;  %v4328_v13 = vcombine.low %v9949_v6, %v9948_v23 }
 0x230   : > { %v4672_v27 = vrot.slane %v4664_v48, %v8317_v44  ;;  %v4665_v33 = vcombine.high %v4599_v49, %v4615_v24  ;;  %v9957_v40 = vcombine.high %v9153_v12, %v9211_v25  ;;  %v9958_v24 = vcombine.low %v9153_v12, %v9211_v25 }
 0x231   : > { %6104 = vxpose.xlu1.b32.start [1/2] (short) (narrow) %v4959_v15, 8  ;;  %v3548_v5 = vrot.slane %v3541_v47, %v8317_v44  ;;  %v4682_v15 = vcombine.low %v4631_v34, %v4663_v11  ;;  %v4640_v60 = vrot.slane %v4632_v63, %v8317_v44  ;;  %v9959_v25 = vcombine.high %v9170_v1, %v9214_v56 }
 0x232   : > { %6072 = vxpose.xlu0.b32.start [1/2] (short) (narrow) %v4958_v55, 8  ;;  %v2681_v21 = vpop.trf.xlu1  ;;  %v2649_v43 = vpop.trf.xlu0  ;;  %v9951_v55 = vld [vmem:[#allocation54_spill] sm:$0xff]  ;;  %v4679_v18 = vrot.slane %v4665_v33, %v8317_v44 }
 0x233   : > { %v3549_v35 = vcombine.low %v3540_v22, %v3548_v5  ;;  %v3550_v17 = vcombine.high %v3540_v22, %v3548_v5  ;;  %v4312_v50 = vcombine.low %v9951_v55, %v9950_v45  ;;  %v4685_v39 = vcombine.high %v4640_v60, %v4672_v27  ;;  %v9954_v5 = vld [vmem:[#allocation45_spill] sm:$0xff] }
 0x234   : > { %v4684_v22 = vcombine.low %v4640_v60, %v4672_v27  ;;  %v4296_v52 = vcombine.low %v9954_v5, %v9953_v19  ;;  %v4313_v27 = vcombine.high %v9951_v55, %v9950_v45 }
 0x235   : > { %6105 = vxpose.xlu1.b32.end [2/2] (short) (narrow) %v9943_v20, 8  ;;  %7502 = vmatprep.subr.mxu0 %v3549_v35  ;;  %v4320_v2 = vrot.slane %v4312_v50, %v8222_v42 }
 0x236   : > { %6073 = vxpose.xlu0.b32.end [2/2] (short) (narrow) %v9944_v14, 8  ;;  %7513 = vmatprep.subr.mxu1 %v3550_v17  ;;  %v9956_v14 = vld [vmem:[#allocation46_spill] sm:$0xff]  ;;  %v4304_v7 = vrot.slane %v4296_v52, %v8222_v42 }
 0x237   : > { %7503 = vmatpush3.msra.mxu0 %v3549_v35  ;;  %7514 = vmatpush3.msra.mxu1 %v3550_v17  ;;  %v4280_v46 = vcombine.low %v9956_v14, %v9955_v62  ;;  %v4336_v35 = vrot.slane %v4328_v13, %v8222_v42 }
 0x239   : > { %5656 = vxpose.xlu1.b32.start [1/2] (short) (narrow) %v4681_v28, 8  ;;  %v4633_v28 = vcombine.high %v4567_v3, %v4583_v32  ;;  %v4377_v60 = vcombine.high %v4320_v2, %v4336_v35 }
 0x23a   : > { %5624 = vxpose.xlu0.b32.start [1/2] (short) (narrow) %v4680_v9, 8  ;;  %v2745_v54 = vpop.trf.xlu1  ;;  %v2713_v26 = vpop.trf.xlu0  ;;  %v4288_v9 = vrot.slane %v4280_v46, %v8222_v42 }
 0x23b   : > { %v3459_v4 = vcombine.low %v2681_v21, %v2745_v54  ;;  %v3451_v0 = vcombine.low %v2649_v43, %v2713_v26  ;;  %v4647_v53 = vrot.slane %v4633_v28, %v8317_v44  ;;  %v4376_v21 = vcombine.low %v4320_v2, %v4336_v35 }
 0x23c   : > { %v4329_v26 = vcombine.high %v9949_v6, %v9948_v23  ;;  %v9963_v2 = vcombine.high %v9120_v59, %v9199_v51 }
 0x23d   : > { %5657 = vxpose.xlu1.b32.end [2/2] (short) (narrow) %v9945_v41, 8  ;;  %v3466_v17 = vrot.slane %v3459_v4, %v8222_v42  ;;  %v3458_v38 = vrot.slane %v3451_v0, %v8222_v42  ;;  %v4687_v43 = vcombine.high %v4647_v53, %v4679_v18  ;;  %v4686_v41 = vcombine.low %v4647_v53, %v4679_v18 }
 0x23e   : > { %5625 = vxpose.xlu0.b32.end [2/2] (short) (narrow) %v9946_v10, 8  ;;  %v4344_v10 = vcombine.low %v4288_v9, %v4304_v7  ;;  %v4281_v4 = vcombine.high %v9956_v14, %v9955_v62  ;;  %v4345_v0 = vcombine.high %v4288_v9, %v4304_v7  ;;  %v4343_v23 = vrot.slane %v4329_v26, %v8222_v42  ;;  %v776_v26 = vld [vmem:[#allocation3 + $0x18] sm:$0xff] }
 0x23f   : > { %v3483_v32 = vcombine.low %v3458_v38, %v3466_v17 }
 0x240   : > { %v4352_v63 = vrot.slane %v4344_v10, %v8317_v44 }
 0x241   : > { %5720 = vxpose.xlu1.b32.start [1/2] (short) (narrow) %v4683_v61, 8  ;;  %v4384_v61 = vrot.slane %v4376_v21, %v8317_v44  ;;  %v3490_v12 = vrot.slane %v3483_v32, %v8317_v44 }
 0x242   : > { %5688 = vxpose.xlu0.b32.start [1/2] (short) (narrow) %v4682_v15, 8  ;;  %v2777_v20 = vpop.trf.xlu0 }
 0x243   : > { %v2809_v47 = vpop.trf.xlu1  ;;  %v4409_v13 = vcombine.high %v4352_v63, %v4384_v61  ;;  %v4408_v33 = vcombine.low %v4352_v63, %v4384_v61  ;;  %v9968_v63 = vcombine.low %v9241_v36, %v9247_v58 }
 0x245   : > { %5721 = vxpose.xlu1.b32.end [2/2] (short) (narrow) %v9947_v8, 8  ;;  %v9960_v8 = vcombine.low %v9170_v1, %v9214_v56  ;;  %v4327_v1 = vrot.slane %v4313_v27, %v8222_v42  ;;  %v4391_v56 = vrot.slane %v4377_v60, %v8317_v44  ;;  %v7695_v27 = vld.sshfl [vmem:[%s8182_s29] sm:$0xf pattern:$0x76325410] }
 0x246   : > { %5689 = vxpose.xlu0.b32.end [2/2] (short) (narrow) %v9952_v57, 8 }
 0x249   : > { %5784 = vxpose.xlu1.b32.start [1/2] (short) (narrow) %v4685_v39, 8  ;;  %v4297_v39 = vcombine.high %v9954_v5, %v9953_v19  ;;  %v9962_v19 = vcombine.low %v9109_v30, %v9193_v31  ;;  %v4392_v5 = vcombine.low %v4327_v1, %v4343_v23 }
 0x24a   : > { %5752 = vxpose.xlu0.b32.start [1/2] (short) (narrow) %v4684_v22, 8  ;;  %v9961_v22 = vcombine.high %v9109_v30, %v9193_v31  ;;  %v9964_v30 = vcombine.low %v9120_v59, %v9199_v51  ;;  %v4393_v31 = vcombine.high %v4327_v1, %v4343_v23  ;;  %v9965_v59 = vcombine.high %v9135_v29, %v9220_v16 }
 0x24b   : > { %v2873_v37 = vpop.trf.xlu1  ;;  %v4311_v55 = vrot.slane %v4297_v39, %v8222_v42  ;;  %v4400_v35 = vrot.slane %v4392_v5, %v8317_v44  ;;  %v7700_v39 = vld.sshfl [vmem:[%s8182_s29 + $0x12] sm:$0xf pattern:$0x76325410] }
 0x24c   : > { %v3475_v49 = vcombine.low %v2809_v47, %v2873_v37  ;;  %v4295_v47 = vrot.slane %v4281_v4, %v8222_v42  ;;  %v7701_v4 = vld.sshfl [vmem:[%s8182_s29 + $0x18] sm:$0xf pattern:$0x76325410] }
 0x24d   : > { %5785 = vxpose.xlu1.b32.end [2/2] (short) (narrow) %v9957_v40, 8  ;;  %v2841_v11 = vpop.trf.xlu0 }
 0x24e   : > { %5753 = vxpose.xlu0.b32.end [2/2] (short) (narrow) %v9958_v24, 8  ;;  %v3467_v3 = vcombine.low %v2777_v20, %v2841_v11  ;;  %v3482_v34 = vrot.slane %v3475_v49, %v8222_v42  ;;  %v4359_v20 = vrot.slane %v4345_v0, %v8317_v44  ;;  %v4360_v14 = vcombine.low %v4295_v47, %v4311_v55  ;;  %v7702_v0 = vld.sshfl [vmem:[%s8182_s29 + $0x1a] sm:$0xf pattern:$0x76325410] }
 0x24f   : > { %v4361_v37 = vcombine.high %v4295_v47, %v4311_v55  ;;  %v4407_v24 = vrot.slane %v4393_v31, %v8317_v44  ;;  %v707_v55 = vcombine.low %v7701_v4, %v7702_v0 }
 0x250   : > { %v3474_v48 = vrot.slane %v3467_v3, %v8222_v42  ;;  %v4411_v52 = vcombine.high %v4359_v20, %v4391_v56  ;;  %v4410_v62 = vcombine.low %v4359_v20, %v4391_v56  ;;  %v4368_v18 = vrot.slane %v4360_v14, %v8317_v44 }
 0x251   : > { %5848 = vxpose.xlu1.b32.start [1/2] (short) (narrow) %v4687_v43, 8  ;;  %v4375_v51 = vrot.slane %v4361_v37, %v8317_v44  ;;  %v9966_v43 = vcombine.low %v9135_v29, %v9220_v16 }
 0x252   : > { %5816 = vxpose.xlu0.b32.start [1/2] (short) (narrow) %v4686_v41, 8  ;;  %v3491_v15 = vcombine.low %v3474_v48, %v3482_v34  ;;  %v4413_v17 = vcombine.high %v4368_v18, %v4400_v35  ;;  %v4412_v40 = vcombine.low %v4368_v18, %v4400_v35 }
 0x253   : > { %v2425_v6 = vpop.trf.xlu1  ;;  %v4415_v41 = vcombine.high %v4375_v51, %v4407_v24  ;;  %v4414_v48 = vcombine.low %v4375_v51, %v4407_v24 }
 0x254   : > { %v3498_v54 = vrot.slane %v3491_v15, %v8317_v44 }
 0x255   : > { %5849 = vxpose.xlu1.b32.end [2/2] (short) (narrow) %v9959_v25, 8  ;;  %v2393_v45 = vpop.trf.xlu0 }
 0x256   : > { %5817 = vxpose.xlu0.b32.end [2/2] (short) (narrow) %v9960_v8, 8  ;;  %v3499_v50 = vcombine.low %v3490_v12, %v3498_v54  ;;  %v3500_v57 = vcombine.high %v3490_v12, %v3498_v54  ;;  %v9967_v12 = vcombine.high %v9241_v36, %v9247_v58  ;;  %v774_v54 = vld [vmem:[#allocation3 + $0x8] sm:$0xff]  ;;  %v7696_v8 = vld.sshfl [vmem:[%s8182_s29 + $0x2] sm:$0xf pattern:$0x76325410] }
 0x257   : > { %v649_v23 = vcombine.low %v7695_v27, %v7696_v8 }
 0x258   : > { %7504 = vmatprep.subr.mxu0 %v3499_v50  ;;  %7515 = vmatprep.subr.mxu1 %v3500_v57 }
 0x259   : > { %5400 = vxpose.xlu1.b32.start [1/2] (short) (narrow) %v4409_v13, 8  ;;  %7505 = vmatpush3.msra.mxu0 %v3499_v50  ;;  %v7697_v50 = vld.sshfl [vmem:[%s8182_s29 + $0x8] sm:$0xf pattern:$0x76325410]  ;;  %v656_v56 = vrot.slane %v649_v23, %v8317_v44 }
 0x25a   : > { %5368 = vxpose.xlu0.b32.start [1/2] (short) (narrow) %v4408_v33, 8  ;;  %7516 = vmatpush3.msra.mxu1 %v3500_v57  ;;  %v7698_v57 = vld.sshfl [vmem:[%s8182_s29 + $0xa] sm:$0xf pattern:$0x76325410] }
 0x25b   : > { %v2489_v46 = vpop.trf.xlu1  ;;  %v7699_v33 = vld.sshfl [vmem:[%s8182_s29 + $0x10] sm:$0xf pattern:$0x76325410]  ;;  %v657_v36 = vcombine.low %v7697_v50, %v7698_v57 }
 0x25c   : > { %v3409_v38 = vcombine.low %v2425_v6, %v2489_v46  ;;  %v699_v6 = vcombine.low %v7699_v33, %v7700_v39 }
 0x25d   : > { %5401 = vxpose.xlu1.b32.end [2/2] (short) (narrow) %v9961_v22, 8  ;;  %v2457_v28 = vpop.trf.xlu0 }
 0x25e   : > { %5369 = vxpose.xlu0.b32.end [2/2] (short) (narrow) %v9962_v19, 8  ;;  %v3401_v7 = vcombine.low %v2393_v45, %v2457_v28  ;;  %v3416_v49 = vrot.slane %v3409_v38, %v8222_v42  ;;  %v664_v45 = vrot.slane %v657_v36, %v8317_v44  ;;  %v706_v47 = vrot.slane %v699_v6, %v8317_v44 }
 0x25f   : > { %v714_v19 = vrot.slane %v707_v55, %v8317_v44 }
 0x260   : > { %v3408_v11 = vrot.slane %v3401_v7, %v8222_v42  ;;  %v665_v22 = vcombine.low %v656_v56, %v664_v45  ;;  %v666_v20 = vcombine.high %v656_v56, %v664_v45 }
 0x261   : > { %5464 = vxpose.xlu1.b32.start [1/2] (short) (narrow) %v4411_v52, 8  ;;  %v715_v14 = vcombine.low %v706_v47, %v714_v19  ;;  %v716_v28 = vcombine.high %v706_v47, %v714_v19 }
 0x262   : > { %5432 = vxpose.xlu0.b32.start [1/2] (short) (narrow) %v4410_v62, 8  ;;  %v3433_v34 = vcombine.low %v3408_v11, %v3416_v49  ;;  %v717_v52 = vmul.f32 0.088388346, %v665_v22  ;;  %v719_v62 = vmul.f32 0.088388346, %v666_v20 }
 0x263   : > { %v2553_v9 = vpop.trf.xlu1  ;;  %v718_v35 = vmul.f32 0.088388346, %v715_v14 }
 0x264   : > { %v3440_v16 = vrot.slane %v3433_v34, %v8317_v44  ;;  %721 = vst.msk [vmem:[#allocation4] sm:$0xff] %vm472_vm0, %v717_v52  ;;  %723 = vst.msk [vmem:[#allocation4 + $0x10] sm:$0xff] %vm472_vm0, %v719_v62 }
 0x265   : > { %5465 = vxpose.xlu1.b32.end [2/2] (short) (narrow) %v9963_v2, 8  ;;  %v2521_v53 = vpop.trf.xlu0  ;;  %v720_v2 = vmul.f32 0.088388346, %v716_v28  ;;  %722 = vst.msk [vmem:[#allocation4 + $0x8] sm:$0xff] %vm472_vm0, %v718_v35 }
 0x266   : > { %5433 = vxpose.xlu0.b32.end [2/2] (short) (narrow) %v9964_v30, 8 }
 0x267   : > { %724 = vst.msk [vmem:[#allocation4 + $0x18] sm:$0xff] %vm472_vm0, %v720_v2 }
 0x269   : > { %5528 = vxpose.xlu1.b32.start [1/2] (short) (narrow) %v4413_v17, 8 }
 0x26a   : > { %5496 = vxpose.xlu0.b32.start [1/2] (short) (narrow) %v4412_v40, 8 }
 0x26b   : > { %v3764_v38 = vld [vmem:[#allocation4] sm:$0xff]  ;;  %v3766_v7 = vld [vmem:[#allocation4 + $0x10] sm:$0xff] }
 0x26d   : > { %5529 = vxpose.xlu1.b32.end [2/2] (short) (narrow) %v9965_v59, 8  ;;  %v2617_v21 = vpop.trf.xlu1 }
 0x26e   : > { %5497 = vxpose.xlu0.b32.end [2/2] (short) (narrow) %v9966_v43, 8  ;;  %v3425_v32 = vcombine.low %v2553_v9, %v2617_v21  ;;  %v2585_v3 = vpop.trf.xlu0 }
 0x26f   : > { %v3417_v10 = vcombine.low %v2521_v53, %v2585_v3 }
 0x270   : > { %v3432_v61 = vrot.slane %v3425_v32, %v8222_v42 }
 0x271   : > { %5592 = vxpose.xlu1.b32.start [1/2] (short) (narrow) %v4415_v41, 8  ;;  %v3424_v15 = vrot.slane %v3417_v10, %v8222_v42 }
 0x272   : > { %5560 = vxpose.xlu0.b32.start [1/2] (short) (narrow) %v4414_v48, 8 }
 0x273   : > { %v3441_v29 = vcombine.low %v3424_v15, %v3432_v61 }
 0x275   : > { %5593 = vxpose.xlu1.b32.end [2/2] (short) (narrow) %v9967_v12, 8  ;;  %v3448_v25 = vrot.slane %v3441_v29, %v8317_v44  ;;  %v6184_v1 = vpop.trf.xlu1 }
 0x276   : > { %5561 = vxpose.xlu0.b32.end [2/2] (short) (narrow) %v9968_v63, 8  ;;  %v6152_v58 = vpop.trf.xlu0 }
 0x277   : > { %v3449_v60 = vcombine.low %v3440_v16, %v3448_v25  ;;  %v3450_v13 = vcombine.high %v3440_v16, %v3448_v25 }
 0x279   : > { %7506 = vmatprep.subr.mxu0 %v3449_v60  ;;  %7517 = vmatprep.subr.mxu1 %v3450_v13 }
 0x27a   : > { %7507 = vmatpush3.msra.mxu0 %v3449_v60  ;;  %7518 = vmatpush3.msra.mxu1 %v3450_v13 }
 0x27b   : > { %7509 = vmatmul.mubr.msk.f32.vlgmr.msra.gmra.mxu0 %vm472_vm0, %v774_v54  ;;  %7520 = vmatmul.mubr.msk.f32.vlgmr.msra.gmra.mxu1 %vm472_vm0, %v776_v26 }
 0x27c   : > { %7530 = vmatprep.mubr.msk.f32.mxu0 %vm472_vm0, %v3764_v38  ;;  %7541 = vmatprep.mubr.msk.f32.mxu1 %vm472_vm0, %v3766_v7 }
 0x27d   : > { %v6248_v5 = vpop.trf.xlu1 }
 0x27e   : > { %v6216_v46 = vpop.trf.xlu0  ;;  %v6550_v18 = vcombine.low %v6184_v1, %v6248_v5 }
 0x27f   : > { %v6542_v30 = vcombine.low %v6152_v58, %v6216_v46 }
 0x280   : > { %v6557_v9 = vrot.slane %v6550_v18, %v8222_v42 }
 0x281   : > { %v6549_v40 = vrot.slane %v6542_v30, %v8222_v42 }
 0x283   : > { %v6574_v49 = vcombine.low %v6549_v40, %v6557_v9 }
 0x285   : > { %v6312_v31 = vpop.trf.xlu1  ;;  %v6581_v43 = vrot.slane %v6574_v49, %v8317_v44 }
 0x286   : > { %v6280_v17 = vpop.trf.xlu0 }
 0x28d   : > { %v6376_v53 = vpop.trf.xlu1 }
 0x28e   : > { %v6566_v37 = vcombine.low %v6312_v31, %v6376_v53  ;;  %v6344_v24 = vpop.trf.xlu0 }
 0x28f   : > { %v6558_v11 = vcombine.low %v6280_v17, %v6344_v24 }
 0x290   : > { %v6573_v59 = vrot.slane %v6566_v37, %v8222_v42 }
 0x291   : > { %v6565_v51 = vrot.slane %v6558_v11, %v8222_v42 }
 0x293   : > { %v6582_v21 = vcombine.low %v6565_v51, %v6573_v59 }
 0x295   : > { %v6589_v32 = vrot.slane %v6582_v21, %v8317_v44  ;;  %v5928_v34 = vpop.trf.xlu1 }
 0x296   : > { %v5896_v10 = vpop.trf.xlu0 }
 0x297   : > { %v6590_v3 = vcombine.low %v6581_v43, %v6589_v32  ;;  %v6591_v41 = vcombine.high %v6581_v43, %v6589_v32 }
 0x299   : > { %7522 = vmatprep.subr.mxu0 %v6590_v3  ;;  %7533 = vmatprep.subr.mxu1 %v6591_v41 }
 0x29a   : > { %7523 = vmatpush3.msra.mxu0 %v6590_v3  ;;  %7534 = vmatpush3.msra.mxu1 %v6591_v41 }
 0x29d   : > { %v5992_v48 = vpop.trf.xlu1 }
 0x29e   : > { %v5960_v61 = vpop.trf.xlu0  ;;  %v6500_v15 = vcombine.low %v5928_v34, %v5992_v48 }
 0x29f   : > { %v6492_v29 = vcombine.low %v5896_v10, %v5960_v61 }
 0x2a0   : > { %v6507_v25 = vrot.slane %v6500_v15, %v8222_v42  ;;  %v3765_v15 = vld [vmem:[#allocation4 + $0x8] sm:$0xff] }
 0x2a1   : > { %v6499_v63 = vrot.slane %v6492_v29, %v8222_v42  ;;  %v3767_v29 = vld [vmem:[#allocation4 + $0x18] sm:$0xff] }
 0x2a3   : > { %v6524_v8 = vcombine.low %v6499_v63, %v6507_v25  ;;  %v7705_v25 = vld.sshfl [vmem:[%s415_s24 + $0x18] sm:$0xf pattern:$0x76325410] }
 0x2a4   : > { %v7706_v63 = vld.sshfl [vmem:[%s415_s24 + $0x1a] sm:$0xf pattern:$0x76325410] }
 0x2a5   : > { %v6056_v16 = vpop.trf.xlu1  ;;  %v6531_v33 = vrot.slane %v6524_v8, %v8317_v44  ;;  %v7708_v8 = vld.sshfl [vmem:[%s415_s24 + $0x2] sm:$0xf pattern:$0x76325410] }
 0x2a6   : > { %v6024_v12 = vpop.trf.xlu0 }
 0x2ad   : > { %v6120_v54 = vpop.trf.xlu1 }
 0x2ae   : > { %v6516_v26 = vcombine.low %v6056_v16, %v6120_v54  ;;  %v6088_v27 = vpop.trf.xlu0  ;;  %v7703_v16 = vld.sshfl [vmem:[%s415_s24 + $0x10] sm:$0xf pattern:$0x76325410] }
 0x2af   : > { %v6508_v60 = vcombine.low %v6024_v12, %v6088_v27  ;;  %v7704_v12 = vld.sshfl [vmem:[%s415_s24 + $0x12] sm:$0xf pattern:$0x76325410]  ;;  %v6868_v27 = vcombine.low %v7705_v25, %v7706_v63 }
 0x2b0   : > { %v6523_v13 = vrot.slane %v6516_v26, %v8222_v42  ;;  %v7707_v54 = vld.sshfl [vmem:[%s415_s24] sm:$0xf pattern:$0x76325410]  ;;  %v6860_v26 = vcombine.low %v7703_v16, %v7704_v12 }
 0x2b1   : > { %v6515_v50 = vrot.slane %v6508_v60, %v8222_v42  ;;  %v7709_v60 = vld.sshfl [vmem:[%s415_s24 + $0x8] sm:$0xf pattern:$0x76325410] }
 0x2b3   : > { %v6532_v57 = vcombine.low %v6515_v50, %v6523_v13  ;;  %v7710_v13 = vld.sshfl [vmem:[%s415_s24 + $0xa] sm:$0xf pattern:$0x76325410]  ;;  %v6867_v50 = vrot.slane %v6860_v26, %v8317_v44 }
 0x2b5   : > { %v6539_v39 = vrot.slane %v6532_v57, %v8317_v44  ;;  %v5672_v23 = vpop.trf.xlu1  ;;  %v6875_v57 = vrot.slane %v6868_v27, %v8317_v44 }
 0x2b6   : > { %v5640_v1 = vpop.trf.xlu0 }
 0x2b7   : > { %v6540_v4 = vcombine.low %v6531_v33, %v6539_v39  ;;  %v6541_v0 = vcombine.high %v6531_v33, %v6539_v39  ;;  %v7950_v33 = vmov 0.0   ;;  %v6876_v39 = vcombine.low %v6867_v50, %v6875_v57 }
 0x2b8   : > { %474 = vst.msk [vmem:[#allocation2 + $0x8] sm:$0xff] %vm472_vm0, %v7950_v33  ;;  %473 = vst.msk [vmem:[#allocation2] sm:$0xff] %vm472_vm0, %v7950_v33 }
 0x2b9   : > { %7524 = vmatprep.subr.mxu0 %v6540_v4  ;;  %7535 = vmatprep.subr.mxu1 %v6541_v0  ;;  %475 = vst.msk [vmem:[#allocation2 + $0x10] sm:$0xff] %vm472_vm0, %v7950_v33  ;;  %476 = vst.msk [vmem:[#allocation2 + $0x18] sm:$0xff] %vm472_vm0, %v7950_v33 }
 0x2ba   : > { %7525 = vmatpush3.msra.mxu0 %v6540_v4  ;;  %7536 = vmatpush3.msra.mxu1 %v6541_v0  ;;  %v6877_v4 = vcombine.high %v6867_v50, %v6875_v57  ;;  %v6810_v0 = vcombine.low %v7707_v54, %v7708_v8 }
 0x2bd   : > { %v5736_v36 = vpop.trf.xlu1 }
 0x2be   : > { %v5704_v58 = vpop.trf.xlu0  ;;  %v6450_v56 = vcombine.low %v5672_v23, %v5736_v36  ;;  %v6818_v23 = vcombine.low %v7709_v60, %v7710_v13 }
 0x2bf   : > { %v6442_v6 = vcombine.low %v5640_v1, %v5704_v58  ;;  %v6817_v1 = vrot.slane %v6810_v0, %v8317_v44 }
 0x2c0   : > { %v6457_v47 = vrot.slane %v6450_v56, %v8222_v42  ;;  %v6825_v36 = vrot.slane %v6818_v23, %v8317_v44 }
 0x2c1   : > { %v6449_v22 = vrot.slane %v6442_v6, %v8222_v42 }
 0x2c2   : > { %v6826_v58 = vcombine.low %v6817_v1, %v6825_v36  ;;  %v6827_v56 = vcombine.high %v6817_v1, %v6825_v36 }
 0x2c3   : > { %v6474_v52 = vcombine.low %v6449_v22, %v6457_v47 }
 0x2c5   : > { %v5800_v45 = vpop.trf.xlu1  ;;  %v6481_v35 = vrot.slane %v6474_v52, %v8317_v44 }
 0x2c6   : > { %v5768_v55 = vpop.trf.xlu0 }
 0x2cd   : > { %v5864_v20 = vpop.trf.xlu1 }
 0x2ce   : > { %v6466_v19 = vcombine.low %v5800_v45, %v5864_v20  ;;  %v5832_v5 = vpop.trf.xlu0 }
 0x2cf   : > { %v6458_v62 = vcombine.low %v5768_v55, %v5832_v5 }
 0x2d0   : > { %v6473_v14 = vrot.slane %v6466_v19, %v8222_v42 }
 0x2d1   : > { %v6465_v46 = vrot.slane %v6458_v62, %v8222_v42 }
 0x2d3   : > { %v6482_v28 = vcombine.low %v6465_v46, %v6473_v14 }
 0x2d5   : > { %v6489_v2 = vrot.slane %v6482_v28, %v8317_v44  ;;  %v5416_v31 = vpop.trf.xlu1 }
 0x2d6   : > { %v5384_v17 = vpop.trf.xlu0 }
 0x2d7   : > { %v6490_v18 = vcombine.low %v6481_v35, %v6489_v2  ;;  %v6491_v30 = vcombine.high %v6481_v35, %v6489_v2 }
 0x2d9   : > { %7526 = vmatprep.subr.mxu0 %v6490_v18  ;;  %7537 = vmatprep.subr.mxu1 %v6491_v30 }
 0x2da   : > { %7527 = vmatpush3.msra.mxu0 %v6490_v18  ;;  %7538 = vmatpush3.msra.mxu1 %v6491_v30 }
 0x2dd   : > { %v5480_v38 = vpop.trf.xlu1 }
 0x2de   : > { %v5448_v7 = vpop.trf.xlu0  ;;  %v6400_v53 = vcombine.low %v5416_v31, %v5480_v38 }
 0x2df   : > { %v6392_v37 = vcombine.low %v5384_v17, %v5448_v7 }
 0x2e0   : > { %v6407_v24 = vrot.slane %v6400_v53, %v8222_v42 }
 0x2e1   : > { %v6399_v49 = vrot.slane %v6392_v37, %v8222_v42 }
 0x2e3   : > { %v6424_v32 = vcombine.low %v6399_v49, %v6407_v24 }
 0x2e5   : > { %v5544_v9 = vpop.trf.xlu1  ;;  %v6431_v34 = vrot.slane %v6424_v32, %v8317_v44 }
 0x2e6   : > { %v5512_v40 = vpop.trf.xlu0 }
 0x2ed   : > { %v5608_v11 = vpop.trf.xlu1 }
 0x2ee   : > { %v6416_v59 = vcombine.low %v5544_v9, %v5608_v11  ;;  %v5576_v51 = vpop.trf.xlu0 }
 0x2ef   : > { %v6408_v21 = vcombine.low %v5512_v40, %v5576_v51  ;;  %v6777_v51 = vld [vmem:[#allocation2 + $0x18] sm:$0xff] }
 0x2f0   : > { %v6423_v43 = vrot.slane %v6416_v59, %v8222_v42  ;;  %v6775_v59 = vld [vmem:[#allocation2 + $0x8] sm:$0xff] }
 0x2f1   : > { %v6415_v3 = vrot.slane %v6408_v21, %v8222_v42 }
 0x2f3   : > { %v6432_v41 = vcombine.low %v6415_v3, %v6423_v43  ;;  %v6774_v43 = vld [vmem:[#allocation2] sm:$0xff] }
 0x2f5   : > { %v6439_v10 = vrot.slane %v6432_v41, %v8317_v44  ;;  %v6776_v41 = vld [vmem:[#allocation2 + $0x10] sm:$0xff] }
 0x2f7   : > { %v6440_v48 = vcombine.low %v6431_v34, %v6439_v10  ;;  %v6441_v61 = vcombine.high %v6431_v34, %v6439_v10 }
 0x2f9   : > { %7528 = vmatprep.subr.mxu0 %v6440_v48  ;;  %7539 = vmatprep.subr.mxu1 %v6441_v61 }
 0x2fa   : > { %7529 = vmatpush3.msra.mxu0 %v6440_v48  ;;  %7540 = vmatpush3.msra.mxu1 %v6441_v61 }
 0x2fb   : > { %7531 = vmatmul.mubr.msk.f32.vlgmr.msra.gmra.mxu0 %vm472_vm0, %v3765_v15  ;;  %7542 = vmatmul.mubr.msk.f32.vlgmr.msra.gmra.mxu1 %vm472_vm0, %v3767_v29 }
 0x2fc   : > { %7544 = vmatprep.subr.mxu0 %v6876_v39  ;;  %7551 = vmatprep.subr.mxu1 %v6877_v4 }
 0x2fd   : > { %7545 = vmatpush3.msra.mxu0 %v6876_v39  ;;  %7552 = vmatpush3.msra.mxu1 %v6877_v4 }
 0x2fe   : > { %7546 = vmatprep.subr.mxu0 %v6826_v58  ;;  %7553 = vmatprep.subr.mxu1 %v6827_v56 }
 0x2ff   : > { %7547 = vmatpush3.msra.mxu0 %v6826_v58  ;;  %7554 = vmatpush3.msra.mxu1 %v6827_v56 }
 0x33b   : > { %v7510_v6 = vpop.f32.mrf.mxu0  ;;  %v7521_v45 = vpop.f32.mrf.mxu1 }
 0x33d   : > { %v3674_v55 = vpop.f32.mrf.mxu0  ;;  %v3755_v47 = vpop.f32.mrf.mxu1 }
 0x3bb   : > { %v7532_v22 = vpop.f32.mrf.mxu0  ;;  %v7543_v20 = vpop.f32.mrf.mxu1 }
 0x3bc   : > { %7671 = vtanh.f32 %v7532_v22 }
 0x3bd   : > { %7673 = vtanh.f32 %v7543_v20  ;;  %v6664_v19 = vpop.f32.mrf.mxu0  ;;  %v6745_v5 = vpop.f32.mrf.mxu1 }
 0x3be   : > { %7675 = vtanh.f32 %v6664_v19 }
 0x3bf   : > { %7677 = vtanh.f32 %v6745_v5 }
 0x3c0   : > { %7679 = vtanh.f32 %v7510_v6 }
 0x3c1   : > { %7681 = vtanh.f32 %v3674_v55 }
 0x3c2   : > { %7683 = vtanh.f32 %v3755_v47 }
 0x3c3   : > { %7685 = vtanh.f32 %v7521_v45 }
 0x3c9   : > { %v7672_v52 = vpop.eup %7671 }
 0x3ca   : > { %v7674_v62 = vpop.eup %7673  ;;  %v6763_v14 = vmul.f32 0.5, %v7672_v52 }
 0x3cb   : > { %v7676_v46 = vpop.eup %7675  ;;  %v6765_v28 = vmul.f32 0.5, %v7674_v62 }
 0x3cc   : > { %v7678_v35 = vpop.eup %7677  ;;  %v6762_v2 = vmul.f32 0.5, %v7676_v46  ;;  %v6767_v18 = vadd.f32 0.5, %v6763_v14 }
 0x3cd   : > { %v6764_v30 = vmul.f32 0.5, %v7678_v35  ;;  %v7680_v31 = vpop.eup %7679  ;;  %v6769_v17 = vadd.f32 0.5, %v6765_v28 }
 0x3ce   : > { %v6766_v38 = vadd.f32 0.5, %v6762_v2  ;;  %v7682_v7 = vpop.eup %7681  ;;  %v6771_v24 = vmul.f32 %v7680_v31, %v6767_v18 }
 0x3cf   : > { %v6768_v9 = vadd.f32 0.5, %v6764_v30  ;;  %v7684_v40 = vpop.eup %7683 }
 0x3d0   : > { %v6770_v53 = vmul.f32 %v7682_v7, %v6766_v38  ;;  %v7686_v37 = vpop.eup %7685 }
 0x3d1   : > { %v6772_v49 = vmul.f32 %v7684_v40, %v6768_v9  ;;  %v6773_v11 = vmul.f32 %v7686_v37, %v6769_v17 }
 0x3d2   : > { %7548 = vmatprep.mubr.msk.f32.mxu0 %vm6878_vm1, %v6770_v53 }
 0x3d3   : > { %7555 = vmatprep.mubr.msk.f32.mxu1 %vm6878_vm1, %v6772_v49  ;;  %7549 = vmatmul.mubr.msk.f32.vlgmr.msra.gmra.mxu0 %vm6878_vm1, %v6771_v24 }
 0x3d4   : > { %7556 = vmatmul.mubr.msk.f32.vlgmr.msra.gmra.mxu1 %vm6878_vm1, %v6773_v11 }
 0x493   : > { %v7550_v21 = vpop.f32.mrf.mxu0 }
 0x494   : > { %v7042_v32 = vadd.f32 %v7550_v21, %v6775_v59  ;;  %v7557_v3 = vpop.f32.mrf.mxu1 }
 0x495   : > { %v7044_v34 = vadd.f32 %v7557_v3, %v6777_v51  ;;  %v6951_v10 = vpop.f32.mrf.mxu0 }
 0x496   : > { %7046 = vst.msk [vmem:[#allocation2 + $0x8] sm:$0xff] %vm472_vm0, %v7042_v32  ;;  %v7041_v48 = vadd.f32 %v6951_v10, %v6774_v43  ;;  %v7032_v61 = vpop.f32.mrf.mxu1 }
 0x497   : > { %7048 = vst.msk [vmem:[#allocation2 + $0x18] sm:$0xff] %vm472_vm0, %v7044_v34  ;;  %v7043_v15 = vadd.f32 %v7032_v61, %v6776_v41 }
 0x498   : > { %7045 = vst.msk [vmem:[#allocation2] sm:$0xff] %vm472_vm0, %v7041_v48 }
 0x499   : > { %7047 = vst.msk [vmem:[#allocation2 + $0x10] sm:$0xff] %vm472_vm0, %v7043_v15 }
 0x49d   : > { %v7053_v29 = vld [vmem:[#allocation2 + $0x8] sm:$0xff] }
 0x49e   : > { %v7122_v16 = vcombine.high %v7053_v29, %v7950_v33  ;;  %v7129_v12 = vrot.slane %v7053_v29, %v8222_v42  ;;  %v7055_v25 = vld [vmem:[#allocation2 + $0x18] sm:$0xff] }
 0x49f   : > { %v7137_v63 = vcombine.high %v7055_v25, %v7950_v33  ;;  %v7144_v54 = vrot.slane %v7055_v25, %v8222_v42  ;;  %v7052_v26 = vld [vmem:[#allocation2] sm:$0xff] }
 0x4a0   : > { %v7136_v27 = vrot.slane %v7122_v16, %v8222_v42  ;;  %v7056_v8 = vcombine.high %v7052_v26, %v7950_v33  ;;  %v7063_v60 = vrot.slane %v7052_v26, %v8222_v42  ;;  %v7054_v13 = vld [vmem:[#allocation2 + $0x10] sm:$0xff] }
 0x4a1   : > { %v7151_v50 = vrot.slane %v7137_v63, %v8222_v42  ;;  %v7152_v57 = vcombine.low %v7129_v12, %v7144_v54  ;;  %v7153_v39 = vcombine.high %v7129_v12, %v7144_v54  ;;  %v7071_v4 = vcombine.high %v7054_v13, %v7950_v33 }
 0x4a2   : > { %v7070_v0 = vrot.slane %v7056_v8, %v8222_v42  ;;  %v7078_v23 = vrot.slane %v7054_v13, %v8222_v42 }
 0x4a3   : > { %v7160_v1 = vrot.slane %v7152_v57, %v8317_v44  ;;  %v7167_v36 = vrot.slane %v7153_v39, %v8317_v44  ;;  %v7168_v58 = vcombine.low %v7136_v27, %v7151_v50  ;;  %v7169_v56 = vcombine.high %v7136_v27, %v7151_v50 }
 0x4a4   : > { %v7085_v6 = vrot.slane %v7071_v4, %v8222_v42  ;;  %v7086_v45 = vcombine.low %v7063_v60, %v7078_v23  ;;  %v7087_v55 = vcombine.high %v7063_v60, %v7078_v23 }
 0x4a5   : > { %v7176_v47 = vrot.slane %v7168_v58, %v8317_v44  ;;  %v7183_v22 = vrot.slane %v7169_v56, %v8317_v44  ;;  %v7184_v20 = vcombine.high %v7160_v1, %v7950_v33  ;;  %v7185_v19 = vcombine.high %v7167_v36, %v7950_v33  ;;  %7197 = vst.msk [vmem:[%s9627_s30 + $0x10] sm:$0x3] %vm7188_vm2, %v7160_v1 }
 0x4a6   : > { %7199 = vst.msk [vmem:[%s9627_s30 + $0x14] sm:$0x3] %vm7188_vm2, %v7167_v36  ;;  %v7094_v42 = vrot.slane %v7086_v45, %v8317_v44  ;;  %v7101_v5 = vrot.slane %v7087_v55, %v8317_v44  ;;  %v7102_v52 = vcombine.low %v7070_v0, %v7085_v6  ;;  %v7103_v62 = vcombine.high %v7070_v0, %v7085_v6 }
 0x4a7   : > { %v7186_v14 = vcombine.high %v7176_v47, %v7950_v33  ;;  %v7187_v46 = vcombine.high %v7183_v22, %v7950_v33  ;;  %7198 = vst.msk [vmem:[%s9627_s30 + $0x12] sm:$0x3] %vm7188_vm2, %v7184_v20  ;;  %7200 = vst.msk [vmem:[%s9627_s30 + $0x16] sm:$0x3] %vm7188_vm2, %v7185_v19 }
 0x4a8   : > { %7201 = vst.msk [vmem:[%s9627_s30 + $0x18] sm:$0x3] %vm7188_vm2, %v7176_v47  ;;  %7203 = vst.msk [vmem:[%s9627_s30 + $0x1c] sm:$0x3] %vm7188_vm2, %v7183_v22  ;;  %v7110_v28 = vrot.slane %v7102_v52, %v8317_v44  ;;  %v7117_v35 = vrot.slane %v7103_v62, %v8317_v44  ;;  %v7118_v2 = vcombine.high %v7094_v42, %v7950_v33 }
 0x4a9   : > { %v7119_v18 = vcombine.high %v7101_v5, %v7950_v33  ;;  %7189 = vst.msk [vmem:[%s9627_s30] sm:$0x3] %vm7188_vm2, %v7094_v42  ;;  %7191 = vst.msk [vmem:[%s9627_s30 + $0x4] sm:$0x3] %vm7188_vm2, %v7101_v5 }
 0x4aa   : > { %7202 = vst.msk [vmem:[%s9627_s30 + $0x1a] sm:$0x3] %vm7188_vm2, %v7186_v14  ;;  %7204 = vst.msk [vmem:[%s9627_s30 + $0x1e] sm:$0x3] %vm7188_vm2, %v7187_v46  ;;  %v7120_v44 = vcombine.high %v7110_v28, %v7950_v33  ;;  %v7121_v30 = vcombine.high %v7117_v35, %v7950_v33 }
 0x4ab   : > { %7190 = vst.msk [vmem:[%s9627_s30 + $0x2] sm:$0x3] %vm7188_vm2, %v7118_v2  ;;  %7192 = vst.msk [vmem:[%s9627_s30 + $0x6] sm:$0x3] %vm7188_vm2, %v7119_v18 }
 0x4ac   : > { %7193 = vst.msk [vmem:[%s9627_s30 + $0x8] sm:$0x3] %vm7188_vm2, %v7110_v28  ;;  %7195 = vst.msk [vmem:[%s9627_s30 + $0xc] sm:$0x3] %vm7188_vm2, %v7117_v35 }
 0x4ad   : > { %7194 = vst.msk [vmem:[%s9627_s30 + $0xa] sm:$0x3] %vm7188_vm2, %v7120_v44  ;;  %7196 = vst.msk [vmem:[%s9627_s30 + $0xe] sm:$0x3] %vm7188_vm2, %v7121_v30 }
 0x4ae   : > { %7864 = shalt.err (!%p7861_p10)
}
 0x4af   : > { %s7865_s3 = scalar_lea.hbm %s9662_s8, 512  ;;  %s7869_s27 = scalar_lea.hbm %s9969_s15, 1024 }
 0x4b0   : > { %p7866_p13 = scmp.ne.s32.totalorder %s9662_s8, %s7865_s3  ;;  %p7870_p6 = scmp.lt.s32.totalorder %s9662_s8, %s9969_s15 }
 0x4b1   : > { %p7871_p1 = scmp.lt.s32.totalorder %s7869_s27, %s7865_s3 }
 0x4b2   : > { %p7867_p12 = pnand %p7866_p13, %p8039_p9 }
 0x4b3   : > { %p7872_p8 = por %p7871_p1, %p7870_p6 }
 0x4b4   : > { %p7868_p5 = pneg %p7867_p12 }
 0x4b6   : > { %p7873_p0 = pnand %p7872_p8, %p7868_p5 }
 0x4b8   : > { %7876 = shalt.err (!%p7873_p0)
}
 0x4b9   : > { %s7952_s12 = smov 32   ;;  %s7953_s13 = smov 2  }
 0x4ba   : > { %7568 = dma.vmem_to_hbm [thread:$0]  (%p8039_p9), %s9664_s18, 512, %s9662_s8, %s7206_s9, %s7952_s12, %s7952_s12, %s7953_s13  }
 0x4bb PF: > { %s9970_s29 = sld [smem:[#allocation19_spill]] }
 0x4bc   : > { %s9972_s23 = sld [smem:[#allocation21_spill]] }
 0x4c1   : > { %s7237_s24 = sand.u32 1, %s9970_s29  }
 0x4c2   : > { %p9973_p3 = scmp.ge.s32.totalorder %s9972_s23, 2  ;;  %s7238_s30 = scalar_lea.sflag [#allocation7], %s7237_s24 }
 0x4c4   : > { %p7587_p4 = pnand %p9973_p3, %p8046_p11 }
 0x4c6   : > { %p7588_p2 = pneg %p7587_p4 }
 0x4c8   : > { %7914 = dma.done.wait (%p7588_p2), %s7238_s30, 512  }
 0x4c9   : > { %7916 = vsyncadd (%p7588_p2), %s7238_s30, 4294966784  ;;  %s27_s23 = sadd.s32 1, %s9972_s23   ;;  %s9974_s6 = sld [smem:[#allocation23_spill]] }
 0x4ca   : > { %p24_p7 = scmp.ge.s32.totalorder %s27_s23, 4   ;;  %s9975_s21 = sld [smem:[#allocation20_spill]] }
 0x4cb   : > { %s9976_s22 = sld [smem:[#allocation22_spill]]  ;;  %s9977_s18 = smov %s7923_s19 }
 0x4cc   : > { %s9978_s19 = smov %s7927_s20  ;;  %26 = sbr.rel (!%p24_p7) target bundleno = 14 (0xe), region = 141 }
 0x4cf   : > { %s9979_s20 = smov %s9974_s6 }
 0x4d1   :  { %7243 = vsyncpa [#allocation6], 1 }
 0x4d2   :  { %7245 = vsyncpa [#allocation6 + $0x1], 1 }
 0x4d3   :  { %7246 = vsyncpa [#allocation9], 1 }
 0x4d4   :  { %7248 = vsyncpa [#allocation9 + $0x1], 1 }
 0x4d5   :  { %7249 = vsyncpa [#allocation12], 1 }
 0x4d6   :  { %7251 = vsyncpa [#allocation12 + $0x1], 1 }
 0x4d7   :  { %7252 = vsyncpa [#allocation7], 1 }
 0x4d8   :  { %7254 = vsyncpa [#allocation7 + $0x1], 1 }

</bundles_post_ra>
